<compile_context>
chip_gen: v7x
topology: tpu7x:2x2x1
jax: 0.10.0
libtpu: 0.0.40
codegen_flags: <defaults>
</compile_context>

<pallas_src>
import jax
import jax.numpy as jnp
from jax.experimental import pallas as pl
from jax.experimental.pallas import tpu as pltpu

GROUP = 8                      # taps packed per group (lane-dense conv1 operand: 8*16=128)
NUM_GROUPS = 16 // GROUP       # grid extent over tap groups
ROWS_PER_SAMPLE = 56           # 49 valid conv2 output positions + 7 zero pad rows (8-aligned)
_VALID_PER_SAMPLE = 49


# ---------------------------------------------------------------------------
# Fused Pallas kernel
# ---------------------------------------------------------------------------

def _make_fused_kernel(n_batch: int, n_rows: int):
    """n_rows = n_batch * ROWS_PER_SAMPLE."""
    inv_cnt = 1.0 / float(n_batch * _VALID_PER_SAMPLE)

    def kernel(p1_ref, w1_ref, w2_ref, gamma_ref, beta_ref, w3_ref, b3_ref,
               valid_ref, o_ref, acc_ref):
        # p1_ref   : [n_rows, 128]  bf16  conv1 input patches, this tap group (8 taps x 16)
        # w1_ref   : [128, 512]     bf16  block-diagonal conv1 weight for a tap group
        # w2_ref   : [512, 128]     bf16  conv2 weight for this tap group (8*64, 128)
        # gamma/beta : [1, 128] f32       BatchNorm affine
        # w3_ref   : [56, 128]  f32       Linear weight, NCHW flatten folded, pad rows = 0
        # b3_ref   : [1, 1]     f32       Linear bias
        # valid_ref: [n_rows, 1] f32      1.0 on real rows, 0.0 on pad rows
        # o_ref    : [n_batch, 1] f32     sigmoid output
        # acc_ref  : [n_rows, 128] f32    conv2 accumulator (VMEM scratch)
        gi = pl.program_id(0)

        @pl.when(gi == 0)
        def _():
            acc_ref[...] = jnp.zeros_like(acc_ref)

        # conv1 for 8 taps at once (lane-packed patches x block-diagonal weight), then
        # LeakyReLU(0.2); conv2 contribution of this tap group accumulated in f32.
        y1 = jnp.dot(p1_ref[...], w1_ref[...], preferred_element_type=jnp.float32)
        y1 = jnp.maximum(y1, 0.2 * y1).astype(jnp.bfloat16)                  # (R, 512)
        acc_ref[...] += jnp.dot(y1, w2_ref[...], preferred_element_type=jnp.float32)

        @pl.when(gi == pl.num_programs(0) - 1)
        def _():
            acc = acc_ref[...]                                               # (R, 128)
            valid = valid_ref[...]                                           # (R, 1)

            # BatchNorm2d, training-mode batch statistics over the N*49 valid rows.
            # Padded rows are exactly zero in acc (zero patches, no biases), so the mean
            # needs no mask; variance is a true two-pass (centered) computation.
            mean = jnp.sum(acc, axis=0, keepdims=True) * inv_cnt             # (1, 128)
            diff = (acc - mean) * valid
            var = jnp.sum(diff * diff, axis=0, keepdims=True) * inv_cnt
            yn = (acc - mean) * jax.lax.rsqrt(var + 1e-5) * gamma_ref[...] + beta_ref[...]
            y2 = jnp.maximum(yn, 0.2 * yn)                                   # LeakyReLU(0.2)

            # Linear(6272 -> 1) + Sigmoid.  The NCHW flatten is folded into w3 (56, 128);
            # its zero pad rows cancel the garbage BN output on padded rows.
            w3 = w3_ref[...]                                                 # (56, 128)
            y2r = y2.reshape(n_batch, ROWS_PER_SAMPLE, 128)
            per_sample = jnp.sum(y2r * w3[None, :, :], axis=1)               # (N, 128)
            out = jnp.sum(per_sample, axis=1, keepdims=True) + b3_ref[...]   # (N, 1)
            o_ref[...] = jax.nn.sigmoid(out)

    return kernel


# ---------------------------------------------------------------------------
# One-time weight preparation (hoisted out of the per-forward path)
# ---------------------------------------------------------------------------

def prepare_params(params):
    w1, w2, gamma, beta, w3, b3 = params
    # conv1 weight as (kh*kw, 64)
    w1m = jnp.transpose(w1.reshape(64, 16), (1, 0))                         # (16, 64) f32
    # Block-diagonal conv1 weight for a lane-packed group of GROUP taps: (128, 512)
    eye = jnp.eye(GROUP, dtype=w1m.dtype)
    w1bd = jnp.einsum('ab,ko->akbo', eye, w1m)
    w1bd = w1bd.reshape(GROUP * 16, GROUP * 64).astype(jnp.bfloat16)
    # conv2 weight per tap (tap, cin, cout) -> grouped (NUM_GROUPS, GROUP*64, 128)
    w2t = jnp.transpose(w2, (2, 3, 1, 0)).reshape(16, 64, 128)
    w2g = w2t.reshape(NUM_GROUPS, GROUP * 64, 128).astype(jnp.bfloat16)
    # Fold PyTorch's NCHW flatten into the Linear weight: row c*49+(h*7+w) -> (h*7+w, c);
    # zero-pad the 49 rows to 56 so pooling works on 8-aligned per-sample blocks.
    w3p = jnp.transpose(w3.reshape(128, 49), (1, 0)).astype(jnp.float32)    # (49, 128)
    w3p = jnp.pad(w3p, ((0, ROWS_PER_SAMPLE - 49), (0, 0)))                 # (56, 128)
    return (w1bd, w2g,
            gamma.reshape(1, 128).astype(jnp.float32),
            beta.reshape(1, 128).astype(jnp.float32),
            w3p,
            b3.reshape(1, 1).astype(jnp.float32))


# ---------------------------------------------------------------------------
# Wrapper-side (XLA) input preparation
# ---------------------------------------------------------------------------

def _conv_tap_patches(x_nchw):
    """[NUM_GROUPS, N*56, GROUP*16] bf16 conv1 input patches, lane-packed per tap group.

    For conv2 tap (kh, kw) and output position (oh, ow) the needed conv1 output sits at
    conv1 position (2*oh+kh-1, 2*ow+kw-1); outside conv1's 14x14 grid it is conv2's zero
    padding, which equals conv1(zero patch) since conv1 has no bias and LeakyReLU(0)==0.
    Rows 49..55 of every sample are zero pad rows (they stay exactly zero through conv).
    """
    n = x_nchw.shape[0]
    x2 = x_nchw.reshape(n, 28, 28).astype(jnp.float32)
    xp = jnp.pad(x2, ((0, 0), (1, 1), (1, 1)))                       # conv1 padding -> 30x30
    cols = [xp[:, i:i + 28:2, j:j + 28:2] for i in range(4) for j in range(4)]
    patches = jnp.stack(cols, axis=-1)                               # (N,14,14,16)
    patches = jnp.pad(patches, ((0, 0), (1, 1), (1, 1), (0, 0)))     # conv2 padding
    taps = [patches[:, kh:kh + 13:2, kw:kw + 13:2, :]                # (N,7,7,16) per tap
            for kh in range(4) for kw in range(4)]
    p = jnp.stack(taps, axis=0).reshape(16, n, 49, 16)               # (16, N, 49, 16)
    p = jnp.pad(p, ((0, 0), (0, 0), (0, ROWS_PER_SAMPLE - 49), (0, 0)))
    r = n * ROWS_PER_SAMPLE
    p = p.reshape(NUM_GROUPS, GROUP, r, 16)
    p = jnp.transpose(p, (0, 2, 1, 3)).reshape(NUM_GROUPS, r, GROUP * 16)
    return p.astype(jnp.bfloat16)


def _vmem_limit_bytes(n_rows):
    p1 = 2 * n_rows * (GROUP * 16) * 2          # double-buffered patch slabs (bf16)
    w2 = 2 * (GROUP * 64) * 128 * 2
    w1 = (GROUP * 16) * (GROUP * 64) * 2
    acc = n_rows * 128 * 4
    y1 = n_rows * (GROUP * 64) * 4              # largest in-kernel intermediate
    misc = (ROWS_PER_SAMPLE * 128 + 4 * 128 + n_rows) * 4 + (1 << 20)
    est = p1 + w2 + w1 + acc + y1 + misc
    return int(min(max(2 * est, 32 << 20), 60 << 20))


# ---------------------------------------------------------------------------
# Forward pass
# ---------------------------------------------------------------------------

def discriminator_forward(x_nchw, prepped):
    w1bd, w2g, gamma, beta, w3p, b3 = prepped
    n = x_nchw.shape[0]
    r = n * ROWS_PER_SAMPLE

    p1t = _conv_tap_patches(x_nchw)
    valid = (jnp.arange(ROWS_PER_SAMPLE, dtype=jnp.int32) < _VALID_PER_SAMPLE)
    valid = jnp.tile(valid.astype(jnp.float32), (n,))[:, None]       # (R, 1)

    args = (p1t, w1bd, w2g, gamma, beta, w3p, b3, valid)

    flops = (NUM_GROUPS * (2 * r * (GROUP * 16) * (GROUP * 64)
                           + 2 * r * (GROUP * 64) * 128)
             + 20 * r * 128 + 4 * n * 128)
    bytes_accessed = sum(int(a.size) * a.dtype.itemsize for a in args) + n * 4
    cost = pl.CostEstimate(flops=flops, transcendentals=128 + n,
                           bytes_accessed=bytes_accessed)

    grid_spec = pltpu.PrefetchScalarGridSpec(
        num_scalar_prefetch=0,
        grid=(NUM_GROUPS,),
        in_specs=[
            pl.BlockSpec((None, r, GROUP * 16), lambda g: (g, 0, 0)),     # p1t (per group)
            pl.BlockSpec((GROUP * 16, GROUP * 64), lambda g: (0, 0)),     # w1 block-diag
            pl.BlockSpec((None, GROUP * 64, 128), lambda g: (g, 0, 0)),   # w2 (per group)
            pl.BlockSpec((1, 128), lambda g: (0, 0)),                     # gamma
            pl.BlockSpec((1, 128), lambda g: (0, 0)),                     # beta
            pl.BlockSpec((ROWS_PER_SAMPLE, 128), lambda g: (0, 0)),       # w3 (56, 128)
            pl.BlockSpec((1, 1), lambda g: (0, 0)),                       # b3
            pl.BlockSpec((r, 1), lambda g: (0, 0)),                       # valid row mask
        ],
        out_specs=pl.BlockSpec((n, 1), lambda g: (0, 0)),
        scratch_shapes=[pltpu.VMEM((r, 128), jnp.float32)],
    )

    out = pl.pallas_call(
        _make_fused_kernel(n, r),
        out_shape=jax.ShapeDtypeStruct((n, 1), jnp.float32),
        grid_spec=grid_spec,
        compiler_params=pltpu.CompilerParams(
            dimension_semantics=("arbitrary",),
            vmem_limit_bytes=_vmem_limit_bytes(r)),
        cost_estimate=cost,
    )(*args)
    return out                                                        # [N, 1]


# ---------------------------------------------------------------------------
# Parameter init + pure-JAX reference (for a tolerance check)
# ---------------------------------------------------------------------------

def init_params(key):
    k1, k2, k3, k4 = jax.random.split(key, 4)
    w1 = 0.05 * jax.random.normal(k1, (64, 1, 4, 4), jnp.float32)      # Conv2d(1, 64, 4)
    w2 = 0.05 * jax.random.normal(k2, (128, 64, 4, 4), jnp.float32)    # Conv2d(64, 128, 4)
    gamma = jnp.ones((128,), jnp.float32)                              # BatchNorm2d weight
    beta = jnp.zeros((128,), jnp.float32)                              # BatchNorm2d bias
    w3 = 0.05 * jax.random.normal(k3, (128 * 7 * 7, 1), jnp.float32)   # Linear(6272, 1)
    b3 = 0.05 * jax.random.normal(k4, (1,), jnp.float32)
    return (w1, w2, gamma, beta, w3, b3)


def _reference_forward(x, params):
    w1, w2, gamma, beta, w3, b3 = params
    dn = ('NCHW', 'OIHW', 'NCHW')
    y = jax.lax.conv_general_dilated(x, w1, (2, 2), ((1, 1), (1, 1)), dimension_numbers=dn)
    y = jnp.maximum(y, 0.2 * y)
    y = jax.lax.conv_general_dilated(y, w2, (2, 2), ((1, 1), (1, 1)), dimension_numbers=dn)
    mean = jnp.mean(y, axis=(0, 2, 3), keepdims=True)
    var = jnp.mean((y - mean) ** 2, axis=(0, 2, 3), keepdims=True)
    y = (y - mean) * jax.lax.rsqrt(var + 1e-5) * gamma.reshape(1, -1, 1, 1) \
        + beta.reshape(1, -1, 1, 1)
    y = jnp.maximum(y, 0.2 * y)
    return jax.nn.sigmoid(y.reshape(x.shape[0], -1) @ w3 + b3)


if __name__ == "__main__":
    key = jax.random.PRNGKey(0)
    k_in, k_par = jax.random.split(key)
    # MNIST-shaped input implied by Linear(128*7*7, 1): [N, 1, 28, 28]
    x = jax.random.normal(k_in, (2, 1, 28, 28), jnp.float32)
    params = init_params(k_par)
    prepped = prepare_params(params)          # one-time weight prep, hoisted out of forward

    fwd = jax.jit(discriminator_forward)
    out = jax.block_until_ready(fwd(x, prepped))

    assert out.shape == (2, 1)
    assert bool(jnp.all((out >= 0.0) & (out <= 1.0)))

    ref = _reference_forward(x, params)       # bf16 matmul operands -> loose tolerance
    assert bool(jnp.max(jnp.abs(out - ref)) < 5e-2)
    print("KERNEL_OK")
</pallas_src>

<mosaic_0001>
module attributes {stable_mosaic.version = 11 : i64} {
  func.func @kernel(%arg0: i32, %arg1: memref<1x112x128xbf16, #tpu.memory_space<vmem>>, %arg2: memref<128x512xbf16, #tpu.memory_space<vmem>>, %arg3: memref<1x512x128xbf16, #tpu.memory_space<vmem>>, %arg4: memref<1x128xf32, #tpu.memory_space<vmem>>, %arg5: memref<1x128xf32, #tpu.memory_space<vmem>>, %arg6: memref<56x128xf32, #tpu.memory_space<vmem>>, %arg7: memref<1x1xf32, #tpu.memory_space<vmem>>, %arg8: memref<112x1xf32, #tpu.memory_space<vmem>>, %arg9: memref<2x1xf32, #tpu.memory_space<vmem>>, %arg10: memref<112x128xf32, #tpu.memory_space<vmem>>) attributes {dimension_semantics = [#tpu.dimension_semantics<arbitrary>], iteration_bounds = array<i64: 2>, scalar_prefetch = 0 : i64, scratch_operands = 1 : i64, tpu.core_type = #tpu.core_type<tc>, window_params = [{transform_indices = @transform_0, window_bounds = array<i64: 1, 112, 128>}, {pipeline_mode = #tpu.pipeline_mode<synchronous>, transform_indices = @transform_1, window_bounds = array<i64: 128, 512>}, {transform_indices = @transform_2, window_bounds = array<i64: 1, 512, 128>}, {pipeline_mode = #tpu.pipeline_mode<synchronous>, transform_indices = @transform_3, window_bounds = array<i64: 1, 128>}, {pipeline_mode = #tpu.pipeline_mode<synchronous>, transform_indices = @transform_4, window_bounds = array<i64: 1, 128>}, {pipeline_mode = #tpu.pipeline_mode<synchronous>, transform_indices = @transform_5, window_bounds = array<i64: 56, 128>}, {pipeline_mode = #tpu.pipeline_mode<synchronous>, transform_indices = @transform_6, window_bounds = array<i64: 1, 1>}, {pipeline_mode = #tpu.pipeline_mode<synchronous>, transform_indices = @transform_7, window_bounds = array<i64: 112, 1>}, {pipeline_mode = #tpu.pipeline_mode<synchronous>, transform_indices = @transform_8, window_bounds = array<i64: 2, 1>}]} {
    %c0_i32 = arith.constant 0 : i32
    %0 = arith.cmpi eq, %arg0, %c0_i32 : i32
    %1 = arith.extui %0 : i1 to i32
    %c0_i32_0 = arith.constant 0 : i32
    %2 = arith.cmpi ne, %1, %c0_i32_0 : i32
    scf.if %2 {
      %cst_15 = arith.constant 0.000000e+00 : f32
      %20 = vector.broadcast %cst_15 : f32 to vector<112x128xf32>
      %c0_16 = arith.constant 0 : index
      %c0_17 = arith.constant 0 : index
      %21 = vector.load %arg10[%c0_16, %c0_17] : memref<112x128xf32, #tpu.memory_space<vmem>>, vector<112x128xf32>
      tpu.vector_store %arg10[%c0_16, %c0_17], %20 {strides = array<i32>} : memref<112x128xf32, #tpu.memory_space<vmem>>, vector<112x128xf32>,
    } else {
    }
    %c0 = arith.constant 0 : index
    %c0_1 = arith.constant 0 : index
    %c0_2 = arith.constant 0 : index
    %3 = vector.load %arg1[%c0, %c0_1, %c0_2] : memref<1x112x128xbf16, #tpu.memory_space<vmem>>, vector<1x112x128xbf16>
    %4 = vector.shape_cast %3 : vector<1x112x128xbf16> to vector<112x128xbf16>
    %c0_3 = arith.constant 0 : index
    %c0_4 = arith.constant 0 : index
    %5 = vector.load %arg2[%c0_3, %c0_4] : memref<128x512xbf16, #tpu.memory_space<vmem>>, vector<128x512xbf16>
    %cst = arith.constant dense<0.000000e+00> : vector<112x512xf32>
    %6 = tpu.matmul %4, %5, %cst {dimension_numbers = #tpu.dot_dimension_numbers<[1], [0], [0], [1], [0, 0, 1, 1], [], []>} : vector<112x128xbf16>, vector<128x512xbf16>, vector<112x512xf32> -> vector<112x512xf32>
    %cst_5 = arith.constant 2.000000e-01 : f32
    %7 = vector.broadcast %cst_5 : f32 to vector<112x512xf32>
    %8 = arith.mulf %7, %6 : vector<112x512xf32>
    %9 = arith.maximumf %6, %8 : vector<112x512xf32>
    %10 = arith.truncf %9 : vector<112x512xf32> to vector<112x512xbf16>
    %c0_6 = arith.constant 0 : index
    %c0_7 = arith.constant 0 : index
    %11 = vector.load %arg10[%c0_6, %c0_7] : memref<112x128xf32, #tpu.memory_space<vmem>>, vector<112x128xf32>
    %c0_8 = arith.constant 0 : index
    %c0_9 = arith.constant 0 : index
    %c0_10 = arith.constant 0 : index
    %12 = vector.load %arg3[%c0_8, %c0_9, %c0_10] : memref<1x512x128xbf16, #tpu.memory_space<vmem>>, vector<1x512x128xbf16>
    %13 = vector.shape_cast %12 : vector<1x512x128xbf16> to vector<512x128xbf16>
    %cst_11 = arith.constant dense<0.000000e+00> : vector<112x128xf32>
    %14 = tpu.matmul %10, %13, %cst_11 {dimension_numbers = #tpu.dot_dimension_numbers<[1], [0], [0], [1], [0, 0, 1, 1], [], []>} : vector<112x512xbf16>, vector<512x128xbf16>, vector<112x128xf32> -> vector<112x128xf32>
    %15 = arith.addf %11, %14 : vector<112x128xf32>
    %c0_12 = arith.constant 0 : index
    %c0_13 = arith.constant 0 : index
    %16 = vector.load %arg10[%c0_12, %c0_13] : memref<112x128xf32, #tpu.memory_space<vmem>>, vector<112x128xf32>
    tpu.vector_store %arg10[%c0_12, %c0_13], %15 {strides = array<i32>} : memref<112x128xf32, #tpu.memory_space<vmem>>, vector<112x128xf32>,
    %c1_i32 = arith.constant 1 : i32
    %17 = arith.cmpi eq, %arg0, %c1_i32 : i32
    %18 = arith.extui %17 : i1 to i32
    %c0_i32_14 = arith.constant 0 : i32
    %19 = arith.cmpi ne, %18, %c0_i32_14 : i32
    scf.if %19 {
      %c0_15 = arith.constant 0 : index
      %c0_16 = arith.constant 0 : index
      %20 = vector.load %arg10[%c0_15, %c0_16] : memref<112x128xf32, #tpu.memory_space<vmem>>, vector<112x128xf32>
      %c0_17 = arith.constant 0 : index
      %c0_18 = arith.constant 0 : index
      %21 = vector.load %arg8[%c0_17, %c0_18] : memref<112x1xf32, #tpu.memory_space<vmem>>, vector<112x1xf32>
      %cst_19 = arith.constant dense<0.000000e+00> : vector<128xf32>
      %22 = vector.multi_reduction <add>, %20, %cst_19 [0] : vector<112x128xf32> to vector<128xf32>
      %23 = vector.shape_cast %22 : vector<128xf32> to vector<1x128xf32>
      %cst_20 = arith.constant 0.0102040814 : f32
      %24 = vector.broadcast %cst_20 : f32 to vector<1x128xf32>
      %25 = arith.mulf %23, %24 : vector<1x128xf32>
      %26 = vector.broadcast %25 : vector<1x128xf32> to vector<112x128xf32>
      %27 = arith.subf %20, %26 : vector<112x128xf32>
      %28 = vector.broadcast %21 : vector<112x1xf32> to vector<112x128xf32>
      %29 = arith.mulf %27, %28 : vector<112x128xf32>
      %30 = arith.mulf %29, %29 : vector<112x128xf32>
      %cst_21 = arith.constant dense<0.000000e+00> : vector<128xf32>
      %31 = vector.multi_reduction <add>, %30, %cst_21 [0] : vector<112x128xf32> to vector<128xf32>
      %32 = vector.shape_cast %31 : vector<128xf32> to vector<1x128xf32>
      %cst_22 = arith.constant 0.0102040814 : f32
      %33 = vector.broadcast %cst_22 : f32 to vector<1x128xf32>
      %34 = arith.mulf %32, %33 : vector<1x128xf32>
      %35 = vector.broadcast %25 : vector<1x128xf32> to vector<112x128xf32>
      %36 = arith.subf %20, %35 : vector<112x128xf32>
      %cst_23 = arith.constant 9.99999974E-6 : f32
      %37 = vector.broadcast %cst_23 : f32 to vector<1x128xf32>
      %38 = arith.addf %34, %37 : vector<1x128xf32>
      %39 = math.rsqrt %38 : vector<1x128xf32>
      %40 = vector.broadcast %39 : vector<1x128xf32> to vector<112x128xf32>
      %41 = arith.mulf %36, %40 : vector<112x128xf32>
      %c0_24 = arith.constant 0 : index
      %c0_25 = arith.constant 0 : index
      %42 = vector.load %arg4[%c0_24, %c0_25] : memref<1x128xf32, #tpu.memory_space<vmem>>, vector<1x128xf32>
      %43 = vector.broadcast %42 : vector<1x128xf32> to vector<112x128xf32>
      %44 = arith.mulf %41, %43 : vector<112x128xf32>
      %c0_26 = arith.constant 0 : index
      %c0_27 = arith.constant 0 : index
      %45 = vector.load %arg5[%c0_26, %c0_27] : memref<1x128xf32, #tpu.memory_space<vmem>>, vector<1x128xf32>
      %46 = vector.broadcast %45 : vector<1x128xf32> to vector<112x128xf32>
      %47 = arith.addf %44, %46 : vector<112x128xf32>
      %cst_28 = arith.constant 2.000000e-01 : f32
      %48 = vector.broadcast %cst_28 : f32 to vector<112x128xf32>
      %49 = arith.mulf %48, %47 : vector<112x128xf32>
      %50 = arith.maximumf %47, %49 : vector<112x128xf32>
      %c0_29 = arith.constant 0 : index
      %c0_30 = arith.constant 0 : index
      %51 = vector.load %arg6[%c0_29, %c0_30] : memref<56x128xf32, #tpu.memory_space<vmem>>, vector<56x128xf32>
      %52 = vector.shape_cast %50 : vector<112x128xf32> to vector<2x56x128xf32>
      %53 = vector.shape_cast %51 : vector<56x128xf32> to vector<1x56x128xf32>
      %54 = vector.broadcast %53 : vector<1x56x128xf32> to vector<2x56x128xf32>
      %55 = arith.mulf %52, %54 : vector<2x56x128xf32>
      %cst_31 = arith.constant dense<0.000000e+00> : vector<2x128xf32>
      %56 = vector.multi_reduction <add>, %55, %cst_31 [1] : vector<2x56x128xf32> to vector<2x128xf32>
      %cst_32 = arith.constant dense<0.000000e+00> : vector<2xf32>
      %57 = vector.multi_reduction <add>, %56, %cst_32 [1] : vector<2x128xf32> to vector<2xf32>
      %58 = vector.shape_cast %57 : vector<2xf32> to vector<2x1xf32>
      %c0_33 = arith.constant 0 : index
      %c0_34 = arith.constant 0 : index
      %59 = vector.load %arg7[%c0_33, %c0_34] : memref<1x1xf32, #tpu.memory_space<vmem>>, vector<1x1xf32>
      %60 = vector.broadcast %59 : vector<1x1xf32> to vector<2x1xf32>
      %61 = arith.addf %58, %60 : vector<2x1xf32>
      %62 = arith.negf %61 : vector<2x1xf32>
      %63 = math.exp %62 : vector<2x1xf32>
      %cst_35 = arith.constant 1.000000e+00 : f32
      %64 = vector.broadcast %cst_35 : f32 to vector<2x1xf32>
      %65 = arith.addf %64, %63 : vector<2x1xf32>
      %66 = arith.divf %64, %65 : vector<2x1xf32>
      %c0_36 = arith.constant 0 : index
      %c0_37 = arith.constant 0 : index
      %67 = vector.load %arg9[%c0_36, %c0_37] : memref<2x1xf32, #tpu.memory_space<vmem>>, vector<2x1xf32>
      tpu.vector_store %arg9[%c0_36, %c0_37], %66 {strides = array<i32>} : memref<2x1xf32, #tpu.memory_space<vmem>>, vector<2x1xf32>,
    } else {
    }
    return
  }
  func.func @transform_0(%arg0: i32) -> (i32, i32, i32) {
    %c0_i32 = arith.constant 0 : i32
    %c0_i32_0 = arith.constant 0 : i32
    %c0_i32_1 = arith.constant 0 : i32
    return %arg0, %c0_i32, %c0_i32_0 : i32, i32, i32
  }
  func.func @transform_1(%arg0: i32) -> (i32, i32) {
    %c0_i32 = arith.constant 0 : i32
    %c0_i32_0 = arith.constant 0 : i32
    %c0_i32_1 = arith.constant 0 : i32
    return %c0_i32, %c0_i32_0 : i32, i32
  }
  func.func @transform_2(%arg0: i32) -> (i32, i32, i32) {
    %c0_i32 = arith.constant 0 : i32
    %c0_i32_0 = arith.constant 0 : i32
    %c0_i32_1 = arith.constant 0 : i32
    return %arg0, %c0_i32, %c0_i32_0 : i32, i32, i32
  }
  func.func @transform_3(%arg0: i32) -> (i32, i32) {
    %c0_i32 = arith.constant 0 : i32
    %c0_i32_0 = arith.constant 0 : i32
    %c0_i32_1 = arith.constant 0 : i32
    return %c0_i32, %c0_i32_0 : i32, i32
  }
  func.func @transform_4(%arg0: i32) -> (i32, i32) {
    %c0_i32 = arith.constant 0 : i32
    %c0_i32_0 = arith.constant 0 : i32
    %c0_i32_1 = arith.constant 0 : i32
    return %c0_i32, %c0_i32_0 : i32, i32
  }
  func.func @transform_5(%arg0: i32) -> (i32, i32) {
    %c0_i32 = arith.constant 0 : i32
    %c0_i32_0 = arith.constant 0 : i32
    %c0_i32_1 = arith.constant 0 : i32
    return %c0_i32, %c0_i32_0 : i32, i32
  }
  func.func @transform_6(%arg0: i32) -> (i32, i32) {
    %c0_i32 = arith.constant 0 : i32
    %c0_i32_0 = arith.constant 0 : i32
    %c0_i32_1 = arith.constant 0 : i32
    return %c0_i32, %c0_i32_0 : i32, i32
  }
  func.func @transform_7(%arg0: i32) -> (i32, i32) {
    %c0_i32 = arith.constant 0 : i32
    %c0_i32_0 = arith.constant 0 : i32
    %c0_i32_1 = arith.constant 0 : i32
    return %c0_i32, %c0_i32_0 : i32, i32
  }
  func.func @transform_8(%arg0: i32) -> (i32, i32) {
    %c0_i32 = arith.constant 0 : i32
    %c0_i32_0 = arith.constant 0 : i32
    %c0_i32_1 = arith.constant 0 : i32
    return %c0_i32, %c0_i32_0 : i32, i32
  }
}

</mosaic_0001>

<bundles_post_ra>
// kernel: tile.8
= control target key start
LH: loop header
LB: loop body
LE: loop exit
PB: predicated region body
PF: predicated region fallthrough
CT: control target
= control target key end

     0   :  { %s22_s0 = inlined_call_operand.vmem [shape: f32[56], index: 0, kind: input, shape index: {}]   ;;  %s23_s1 = inlined_call_operand.vmem [shape: f32[2,56], index: 1, kind: output, shape index: {}]  }
   0x1   :  { %v4_v0 = vld [vmem:[%s22_s0] ss:$0 sm:$0xff] }
   0x2   :  { %5 = vst [vmem:[%s23_s1] sm:$0x3] %v4_v0 }

// kernel: tile.0
= control target key start
LH: loop header
LB: loop body
LE: loop exit
PB: predicated region body
PF: predicated region fallthrough
CT: control target
= control target key end

     0   :  { %s530_s8 = smov 125   ;;  %s531_s9 = smov 126   ;;  %vm7_vm0 = vcmask 7168   ;;  %s821_s0 = inlined_call_operand.vmem [shape: f32[2,56], index: 0, kind: input, shape index: {}]   ;;  %s822_s1 = inlined_call_operand.vmem [shape: f32[112,1], index: 1, kind: output, shape index: {}]  }
   0x1   :  { %v4_v0 = vld [vmem:[%s821_s0] sm:$0x3]  ;;  %s529_s0 = smov 127   ;;  %s532_s10 = smov 124  }
   0x2   :  { %5 = vst [vmem:[#allocation0] sm:$0x3] %v4_v0  ;;  %s52_s11 = smov 3  ;;  %s533_s12 = smov 123  }
   0x3   :  { %s534_s13 = smov 122   ;;  %s60_s14 = smov 3 }
   0x4   :  { %s68_s15 = smov 3  ;;  %s535_s16 = smov 121  }
   0x5   :  { %s536_s17 = smov 120   ;;  %s76_s18 = smov 3 }
   0x6   :  { %s84_s19 = smov 3  ;;  %s537_s20 = smov 119  }
   0x7   :  { %s538_s21 = smov 118   ;;  %s92_s22 = smov 3 }
   0x8   :  { %s100_s23 = smov 3  ;;  %s539_s24 = smov 117  }
   0x9   :  { %v9_v1 = vld [vmem:[#allocation0] sm:$0x3]   ;;  %s540_s25 = smov 116   ;;  %s108_s26 = smov 3 }
   0xa   :  { %v21_v2 = vld [vmem:[#allocation0] sm:$0x3]   ;;  %10 = vrot.lane.b32.xlu0 %v9_v1, %s529_s0  ;;  %s116_s27 = smov 3  ;;  %s541_s28 = smov 115  }
   0xb   :  { %22 = vrot.lane.b32.xlu1 %v21_v2, %s530_s8  ;;  %v15_v3 = vld [vmem:[#allocation0] sm:$0x3]   ;;  %s542_s29 = smov 114   ;;  %s124_s30 = smov 3 }
   0xc   :  { %v27_v4 = vld [vmem:[#allocation0] sm:$0x3]   ;;  %s132_s2 = smov 3  ;;  %s543_s3 = smov 113  }
   0xd   :  { %v33_v5 = vld [vmem:[#allocation0] sm:$0x3]   ;;  %s544_s4 = smov 112   ;;  %s140_s5 = smov 3 }
   0xe   :  { %16 = vrot.lane.b32.xlu0 %v15_v3, %s531_s9  ;;  %v39_v6 = vld [vmem:[#allocation0] sm:$0x3]   ;;  %s148_s6 = smov 3  ;;  %s545_s7 = smov 111  }
   0xf   :  { %28 = vrot.lane.b32.xlu1 %v27_v4, %s532_s10  ;;  %v45_v7 = vld [vmem:[#allocation0] sm:$0x3]   ;;  %s546_s0 = smov 110   ;;  %s156_s8 = smov 3 }
  0x10   :  { %v53_v8 = vld [vmem:[#allocation0 + $0x1] ss:$-1 sm:%s52_s11]   ;;  %s164_s9 = smov 3  ;;  %s547_s10 = smov 109  }
  0x11   :  { %v61_v9 = vld [vmem:[#allocation0 + $0x1] ss:$-1 sm:%s60_s14]   ;;  %s548_s11 = smov 108   ;;  %s549_s14 = smov 107  }
  0x12   :  { %34 = vrot.lane.b32.xlu0 %v33_v5, %s533_s12  ;;  %v69_v10 = vld [vmem:[#allocation0 + $0x1] ss:$-1 sm:%s68_s15]   ;;  %s172_s12 = smov 3  ;;  %s550_s15 = smov 106  }
  0x13   :  { %40 = vrot.lane.b32.xlu1 %v39_v6, %s534_s13  ;;  %v77_v11 = vld [vmem:[#allocation0 + $0x1] ss:$-1 sm:%s76_s18]   ;;  %s180_s13 = smov 3  ;;  %s551_s18 = smov 105  }
  0x14   :  { %v85_v12 = vld [vmem:[#allocation0 + $0x1] ss:$-1 sm:%s84_s19]   ;;  %s552_s19 = smov 104  }
  0x15   :  { %v93_v13 = vld [vmem:[#allocation0 + $0x1] ss:$-1 sm:%s92_s22]   ;;  %s553_s22 = smov 103  }
  0x16   :  { %46 = vrot.lane.b32.xlu0 %v45_v7, %s535_s16  ;;  %v101_v14 = vld [vmem:[#allocation0 + $0x1] ss:$-1 sm:%s100_s23]   ;;  %s188_s16 = smov 3  ;;  %s554_s23 = smov 102  }
  0x17   :  { %54 = vrot.lane.b32.xlu1 %v53_v8, %s536_s17  ;;  %v109_v15 = vld [vmem:[#allocation0 + $0x1] ss:$-1 sm:%s108_s26]   ;;  %s196_s17 = smov 3  ;;  %s555_s26 = smov 101  }
  0x18   :  { %v117_v16 = vld [vmem:[#allocation0 + $0x1] ss:$-1 sm:%s116_s27]   ;;  %s556_s27 = smov 100  }
  0x19   :  { %v125_v17 = vld [vmem:[#allocation0 + $0x1] ss:$-1 sm:%s124_s30]   ;;  %s558_s30 = smov 98  }
  0x1a   :  { %62 = vrot.lane.b32.xlu0 %v61_v9, %s537_s20  ;;  %v133_v18 = vld [vmem:[#allocation0 + $0x1] ss:$-1 sm:%s132_s2]   ;;  %s204_s20 = smov 3  ;;  %s559_s2 = smov 97  }
  0x1b   :  { %70 = vrot.lane.b32.xlu1 %v69_v10, %s538_s21  ;;  %v141_v19 = vld [vmem:[#allocation0 + $0x1] ss:$-1 sm:%s140_s5]   ;;  %s212_s21 = smov 3  ;;  %s562_s5 = smov 94  }
  0x1c   :  { %v149_v20 = vld [vmem:[#allocation0 + $0x1] ss:$-1 sm:%s148_s6]   ;;  %s563_s6 = smov 93  }
  0x1d   :  { %v157_v21 = vld [vmem:[#allocation0 + $0x1] ss:$-1 sm:%s156_s8]   ;;  %s565_s8 = smov 91  }
  0x1e   :  { %78 = vrot.lane.b32.xlu0 %v77_v11, %s539_s24  ;;  %v165_v22 = vld [vmem:[#allocation0 + $0x1] ss:$-1 sm:%s164_s9]   ;;  %s220_s24 = smov 3  ;;  %s566_s9 = smov 90  }
  0x1f   :  { %86 = vrot.lane.b32.xlu1 %v85_v12, %s540_s25  ;;  %v173_v23 = vld [vmem:[#allocation0 + $0x1] ss:$-1 sm:%s172_s12]   ;;  %s228_s25 = smov 3  ;;  %s567_s12 = smov 89  }
  0x20   :  { %v181_v24 = vld [vmem:[#allocation0 + $0x1] ss:$-1 sm:%s180_s13]   ;;  %s568_s13 = smov 88  }
  0x21   :  { %v189_v25 = vld [vmem:[#allocation0 + $0x1] ss:$-1 sm:%s188_s16]   ;;  %s569_s16 = smov 87  }
  0x22   :  { %94 = vrot.lane.b32.xlu0 %v93_v13, %s541_s28  ;;  %v197_v26 = vld [vmem:[#allocation0 + $0x1] ss:$-1 sm:%s196_s17]   ;;  %s236_s28 = smov 3  ;;  %s570_s17 = smov 86  }
  0x23   :  { %102 = vrot.lane.b32.xlu1 %v101_v14, %s542_s29  ;;  %v205_v27 = vld [vmem:[#allocation0 + $0x1] ss:$-1 sm:%s204_s20]   ;;  %s557_s29 = smov 99   ;;  %s571_s20 = smov 85  }
  0x24   :  { %v213_v28 = vld [vmem:[#allocation0 + $0x1] ss:$-1 sm:%s212_s21]   ;;  %s572_s21 = smov 84  }
  0x25   :  { %v221_v29 = vld [vmem:[#allocation0 + $0x1] ss:$-1 sm:%s220_s24]   ;;  %s573_s24 = smov 83  }
  0x26   :  { %110 = vrot.lane.b32.xlu0 %v109_v15, %s543_s3  ;;  %v229_v30 = vld [vmem:[#allocation0 + $0x1] ss:$-1 sm:%s228_s25]   ;;  %s560_s3 = smov 96   ;;  %s574_s25 = smov 82  }
  0x27   :  { %118 = vrot.lane.b32.xlu1 %v117_v16, %s544_s4  ;;  %v237_v31 = vld [vmem:[#allocation0 + $0x1] ss:$-1 sm:%s236_s28]   ;;  %s561_s4 = smov 95   ;;  %s575_s28 = smov 81  }
  0x28   :  { %v243_v32 = vld [vmem:[#allocation0] sm:$0x3]  }
  0x29   :  { %v249_v33 = vld [vmem:[#allocation0] sm:$0x3]  }
  0x2a   :  { %126 = vrot.lane.b32.xlu0 %v125_v17, %s545_s7  ;;  %v255_v34 = vld [vmem:[#allocation0] sm:$0x3]   ;;  %s564_s7 = smov 92  }
  0x2b   :  { %134 = vrot.lane.b32.xlu1 %v133_v18, %s546_s0  ;;  %v261_v35 = vld [vmem:[#allocation0] sm:$0x3]   ;;  %s292_s0 = smov 3 }
  0x2c   :  { %v267_v36 = vld [vmem:[#allocation0] sm:$0x3]  }
  0x2d   :  { %v273_v37 = vld [vmem:[#allocation0] sm:$0x3]  }
  0x2e   :  { %142 = vrot.lane.b32.xlu0 %v141_v19, %s547_s10  ;;  %v279_v38 = vld [vmem:[#allocation0] sm:$0x3]   ;;  %s300_s10 = smov 3 }
  0x2f   :  { %150 = vrot.lane.b32.xlu1 %v149_v20, %s548_s11  ;;  %v285_v39 = vld [vmem:[#allocation0] sm:$0x3]   ;;  %s308_s11 = smov 3 }
  0x30   :  { %v293_v40 = vld [vmem:[#allocation0 + $0x1] ss:$-1 sm:%s292_s0]   ;;  %s404_s0 = smov 3 }
  0x31   :  { %v301_v41 = vld [vmem:[#allocation0 + $0x1] ss:$-1 sm:%s300_s10]   ;;  %s412_s10 = smov 3 }
  0x32   :  { %158 = vrot.lane.b32.xlu0 %v157_v21, %s549_s14  ;;  %v309_v42 = vld [vmem:[#allocation0 + $0x1] ss:$-1 sm:%s308_s11]   ;;  %s316_s14 = smov 3  ;;  %s581_s11 = smov 75  }
  0x33   :  { %166 = vrot.lane.b32.xlu1 %v165_v22, %s550_s15  ;;  %s324_s15 = smov 3  ;;  %v317_v43 = vld [vmem:[#allocation0 + $0x1] ss:$-1 sm:%s316_s14]  }
  0x34   :  { %v325_v44 = vld [vmem:[#allocation0 + $0x1] ss:$-1 sm:%s324_s15]  }
  0x35   :  { %v6_v51 = vld [vmem:[#allocation0] sm:$0x3]  }
  0x36   :  { %174 = vrot.lane.b32.xlu0 %v173_v23, %s551_s18  ;;  %s332_s18 = smov 3  ;;  %8 = vst.msk [vmem:[%s822_s1] ss:$56 sm:$0x3] %vm7_vm0, %v6_v51   ;;  %v405_v55 = vld [vmem:[#allocation0 + $0x1] ss:$-1 sm:%s404_s0]  }
  0x37   :  { %182 = vrot.lane.b32.xlu1 %v181_v24, %s552_s19  ;;  %s340_s19 = smov 3  ;;  %v333_v45 = vld [vmem:[#allocation0 + $0x1] ss:$-1 sm:%s332_s18]  }
  0x38   :  { %v341_v46 = vld [vmem:[#allocation0 + $0x1] ss:$-1 sm:%s340_s19]  }
  0x39   :  { %v413_v56 = vld [vmem:[#allocation0 + $0x1] ss:$-1 sm:%s412_s10]  }
  0x3a   :  { %190 = vrot.lane.b32.xlu0 %v189_v25, %s553_s22  ;;  %s348_s22 = smov 3 }
  0x3b   :  { %198 = vrot.lane.b32.xlu1 %v197_v26, %s554_s23  ;;  %s356_s23 = smov 3  ;;  %v349_v47 = vld [vmem:[#allocation0 + $0x1] ss:$-1 sm:%s348_s22]  }
  0x3c   :  { %v357_v48 = vld [vmem:[#allocation0 + $0x1] ss:$-1 sm:%s356_s23]  }
  0x3e   :  { %206 = vrot.lane.b32.xlu0 %v205_v27, %s555_s26  ;;  %s364_s26 = smov 3 }
  0x3f   :  { %214 = vrot.lane.b32.xlu1 %v213_v28, %s556_s27  ;;  %s372_s27 = smov 3  ;;  %v365_v49 = vld [vmem:[#allocation0 + $0x1] ss:$-1 sm:%s364_s26]  }
  0x40   :  { %v373_v50 = vld [vmem:[#allocation0 + $0x1] ss:$-1 sm:%s372_s27]  }
  0x42   :  { %222 = vrot.lane.b32.xlu0 %v221_v29, %s557_s29  ;;  %s576_s29 = smov 80  }
  0x43   :  { %230 = vrot.lane.b32.xlu1 %v229_v30, %s558_s30  ;;  %s380_s30 = smov 3 }
  0x44   :  { %v381_v52 = vld [vmem:[#allocation0 + $0x1] ss:$-1 sm:%s380_s30]  }
  0x46   :  { %238 = vrot.lane.b32.xlu0 %v237_v31, %s559_s2  ;;  %s388_s2 = smov 3 }
  0x47   :  { %244 = vrot.lane.b32.xlu1 %v243_v32, %s560_s3  ;;  %v389_v53 = vld [vmem:[#allocation0 + $0x1] ss:$-1 sm:%s388_s2]  }
  0x4a   :  { %250 = vrot.lane.b32.xlu0 %v249_v33, %s561_s4 }
  0x4b   :  { %256 = vrot.lane.b32.xlu1 %v255_v34, %s562_s5  ;;  %s577_s5 = smov 79  }
  0x4e   :  { %262 = vrot.lane.b32.xlu0 %v261_v35, %s563_s6  ;;  %s578_s6 = smov 78  }
  0x4f   :  { %268 = vrot.lane.b32.xlu1 %v267_v36, %s564_s7  ;;  %s396_s7 = smov 3 }
  0x50   :  { %v397_v54 = vld [vmem:[#allocation0 + $0x1] ss:$-1 sm:%s396_s7]  }
  0x52   :  { %274 = vrot.lane.b32.xlu0 %v273_v37, %s565_s8  ;;  %s579_s8 = smov 77  }
  0x53   :  { %280 = vrot.lane.b32.xlu1 %v279_v38, %s566_s9  ;;  %s580_s9 = smov 76  }
  0x56   :  { %286 = vrot.lane.b32.xlu0 %v285_v39, %s567_s12  ;;  %s582_s12 = smov 74  }
  0x57   :  { %294 = vrot.lane.b32.xlu1 %v293_v40, %s568_s13  ;;  %s583_s13 = smov 73  }
  0x5a   :  { %302 = vrot.lane.b32.xlu0 %v301_v41, %s569_s16 }
  0x5b   :  { %310 = vrot.lane.b32.xlu1 %v309_v42, %s570_s17 }
  0x5e   :  { %318 = vrot.lane.b32.xlu0 %v317_v43, %s571_s20 }
  0x5f   :  { %326 = vrot.lane.b32.xlu1 %v325_v44, %s572_s21 }
  0x62   :  { %334 = vrot.lane.b32.xlu0 %v333_v45, %s573_s24 }
  0x63   :  { %342 = vrot.lane.b32.xlu1 %v341_v46, %s574_s25 }
  0x66   :  { %350 = vrot.lane.b32.xlu0 %v349_v47, %s575_s28 }
  0x67   :  { %358 = vrot.lane.b32.xlu1 %v357_v48, %s576_s29 }
  0x6a   :  { %366 = vrot.lane.b32.xlu0 %v365_v49, %s577_s5 }
  0x6b   :  { %374 = vrot.lane.b32.xlu1 %v373_v50, %s578_s6 }
  0x6e   :  { %382 = vrot.lane.b32.xlu0 %v381_v52, %s579_s8 }
  0x6f   :  { %390 = vrot.lane.b32.xlu1 %v389_v53, %s580_s9 }
  0x72   :  { %398 = vrot.lane.b32.xlu0 %v397_v54, %s581_s11 }
  0x73   :  { %406 = vrot.lane.b32.xlu1 %v405_v55, %s582_s12 }
  0x76   :  { %414 = vrot.lane.b32.xlu0 %v413_v56, %s583_s13 }
  0x7c   :  { %v11_v57 = vpop.permute.xlu0 %10  }
  0x7d   :  { %v23_v58 = vpop.permute.xlu1 %22   ;;  %419 = vst.msk [vmem:[%s822_s1 + $0x1] ss:$56 sm:$0x3] %vm7_vm0, %v11_v57  }
  0x7e   :  { %421 = vst.msk [vmem:[%s822_s1 + $0x3] ss:$56 sm:$0x3] %vm7_vm0, %v23_v58  }
  0x80   :  { %v17_v59 = vpop.permute.xlu0 %16  }
  0x81   :  { %v29_v60 = vpop.permute.xlu1 %28   ;;  %420 = vst.msk [vmem:[%s822_s1 + $0x2] ss:$56 sm:$0x3] %vm7_vm0, %v17_v59  }
  0x82   :  { %422 = vst.msk [vmem:[%s822_s1 + $0x4] ss:$56 sm:$0x3] %vm7_vm0, %v29_v60  }
  0x84   :  { %v35_v61 = vpop.permute.xlu0 %34  }
  0x85   :  { %v41_v62 = vpop.permute.xlu1 %40   ;;  %423 = vst.msk [vmem:[%s822_s1 + $0x5] ss:$56 sm:$0x3] %vm7_vm0, %v35_v61  }
  0x86   :  { %424 = vst.msk [vmem:[%s822_s1 + $0x6] ss:$56 sm:$0x3] %vm7_vm0, %v41_v62  }
  0x88   :  { %v47_v63 = vpop.permute.xlu0 %46  }
  0x89   :  { %v55_v0 = vpop.permute.xlu1 %54   ;;  %425 = vst.msk [vmem:[%s822_s1 + $0x7] ss:$56 sm:$0x3] %vm7_vm0, %v47_v63  }
  0x8a   :  { %426 = vst.msk [vmem:[%s822_s1 + $0x40] ss:$-56 sm:$0x3] %vm7_vm0, %v55_v0  }
  0x8c   :  { %v63_v1 = vpop.permute.xlu0 %62  }
  0x8d   :  { %v71_v2 = vpop.permute.xlu1 %70   ;;  %427 = vst.msk [vmem:[%s822_s1 + $0x41] ss:$-56 sm:$0x3] %vm7_vm0, %v63_v1  }
  0x8e   :  { %428 = vst.msk [vmem:[%s822_s1 + $0x42] ss:$-56 sm:$0x3] %vm7_vm0, %v71_v2  }
  0x90   :  { %v79_v3 = vpop.permute.xlu0 %78  }
  0x91   :  { %v87_v4 = vpop.permute.xlu1 %86   ;;  %429 = vst.msk [vmem:[%s822_s1 + $0x43] ss:$-56 sm:$0x3] %vm7_vm0, %v79_v3  }
  0x92   :  { %430 = vst.msk [vmem:[%s822_s1 + $0x44] ss:$-56 sm:$0x3] %vm7_vm0, %v87_v4  }
  0x94   :  { %v95_v5 = vpop.permute.xlu0 %94  }
  0x95   :  { %v103_v6 = vpop.permute.xlu1 %102   ;;  %431 = vst.msk [vmem:[%s822_s1 + $0x45] ss:$-56 sm:$0x3] %vm7_vm0, %v95_v5  }
  0x96   :  { %432 = vst.msk [vmem:[%s822_s1 + $0x46] ss:$-56 sm:$0x3] %vm7_vm0, %v103_v6  }
  0x98   :  { %v111_v7 = vpop.permute.xlu0 %110  }
  0x99   :  { %v119_v8 = vpop.permute.xlu1 %118   ;;  %433 = vst.msk [vmem:[%s822_s1 + $0x47] ss:$-56 sm:$0x3] %vm7_vm0, %v111_v7  }
  0x9a   :  { %434 = vst.msk [vmem:[%s822_s1 + $0x48] ss:$-56 sm:$0x3] %vm7_vm0, %v119_v8  }
  0x9c   :  { %v127_v9 = vpop.permute.xlu0 %126  }
  0x9d   :  { %v135_v10 = vpop.permute.xlu1 %134   ;;  %435 = vst.msk [vmem:[%s822_s1 + $0x49] ss:$-56 sm:$0x3] %vm7_vm0, %v127_v9  }
  0x9e   :  { %436 = vst.msk [vmem:[%s822_s1 + $0x4a] ss:$-56 sm:$0x3] %vm7_vm0, %v135_v10  }
  0xa0   :  { %v143_v11 = vpop.permute.xlu0 %142  }
  0xa1   :  { %v151_v12 = vpop.permute.xlu1 %150   ;;  %437 = vst.msk [vmem:[%s822_s1 + $0x4b] ss:$-56 sm:$0x3] %vm7_vm0, %v143_v11  }
  0xa2   :  { %438 = vst.msk [vmem:[%s822_s1 + $0x4c] ss:$-56 sm:$0x3] %vm7_vm0, %v151_v12  }
  0xa4   :  { %v159_v13 = vpop.permute.xlu0 %158  }
  0xa5   :  { %v167_v14 = vpop.permute.xlu1 %166   ;;  %439 = vst.msk [vmem:[%s822_s1 + $0x4d] ss:$-56 sm:$0x3] %vm7_vm0, %v159_v13  }
  0xa6   :  { %440 = vst.msk [vmem:[%s822_s1 + $0x4e] ss:$-56 sm:$0x3] %vm7_vm0, %v167_v14  }
  0xa8   :  { %v175_v15 = vpop.permute.xlu0 %174  }
  0xa9   :  { %v183_v16 = vpop.permute.xlu1 %182   ;;  %441 = vst.msk [vmem:[%s822_s1 + $0x4f] ss:$-56 sm:$0x3] %vm7_vm0, %v175_v15  }
  0xaa   :  { %442 = vst.msk [vmem:[%s822_s1 + $0x50] ss:$-56 sm:$0x3] %vm7_vm0, %v183_v16  }
  0xac   :  { %v191_v17 = vpop.permute.xlu0 %190  }
  0xad   :  { %v199_v18 = vpop.permute.xlu1 %198   ;;  %443 = vst.msk [vmem:[%s822_s1 + $0x51] ss:$-56 sm:$0x3] %vm7_vm0, %v191_v17  }
  0xae   :  { %444 = vst.msk [vmem:[%s822_s1 + $0x52] ss:$-56 sm:$0x3] %vm7_vm0, %v199_v18  }
  0xb0   :  { %v207_v19 = vpop.permute.xlu0 %206  }
  0xb1   :  { %v215_v20 = vpop.permute.xlu1 %214   ;;  %445 = vst.msk [vmem:[%s822_s1 + $0x53] ss:$-56 sm:$0x3] %vm7_vm0, %v207_v19  }
  0xb2   :  { %446 = vst.msk [vmem:[%s822_s1 + $0x54] ss:$-56 sm:$0x3] %vm7_vm0, %v215_v20  }
  0xb4   :  { %v223_v21 = vpop.permute.xlu0 %222  }
  0xb5   :  { %v231_v22 = vpop.permute.xlu1 %230   ;;  %447 = vst.msk [vmem:[%s822_s1 + $0x55] ss:$-56 sm:$0x3] %vm7_vm0, %v223_v21  }
  0xb6   :  { %448 = vst.msk [vmem:[%s822_s1 + $0x56] ss:$-56 sm:$0x3] %vm7_vm0, %v231_v22  }
  0xb8   :  { %v239_v23 = vpop.permute.xlu0 %238  }
  0xb9   :  { %v245_v24 = vpop.permute.xlu1 %244   ;;  %449 = vst.msk [vmem:[%s822_s1 + $0x57] ss:$-56 sm:$0x3] %vm7_vm0, %v239_v23  }
  0xba   :  { %450 = vst.msk [vmem:[%s822_s1 + $0x20] ss:$56 sm:$0x3] %vm7_vm0, %v245_v24  }
  0xbc   :  { %v251_v25 = vpop.permute.xlu0 %250  }
  0xbd   :  { %v257_v26 = vpop.permute.xlu1 %256   ;;  %451 = vst.msk [vmem:[%s822_s1 + $0x21] ss:$56 sm:$0x3] %vm7_vm0, %v251_v25  }
  0xbe   :  { %452 = vst.msk [vmem:[%s822_s1 + $0x22] ss:$56 sm:$0x3] %vm7_vm0, %v257_v26  }
  0xc0   :  { %v263_v27 = vpop.permute.xlu0 %262  }
  0xc1   :  { %v269_v28 = vpop.permute.xlu1 %268   ;;  %453 = vst.msk [vmem:[%s822_s1 + $0x23] ss:$56 sm:$0x3] %vm7_vm0, %v263_v27  }
  0xc2   :  { %454 = vst.msk [vmem:[%s822_s1 + $0x24] ss:$56 sm:$0x3] %vm7_vm0, %v269_v28  }
  0xc4   :  { %v275_v29 = vpop.permute.xlu0 %274  }
  0xc5   :  { %v281_v30 = vpop.permute.xlu1 %280   ;;  %455 = vst.msk [vmem:[%s822_s1 + $0x25] ss:$56 sm:$0x3] %vm7_vm0, %v275_v29  }
  0xc6   :  { %456 = vst.msk [vmem:[%s822_s1 + $0x26] ss:$56 sm:$0x3] %vm7_vm0, %v281_v30  }
  0xc8   :  { %v287_v31 = vpop.permute.xlu0 %286  }
  0xc9   :  { %v295_v32 = vpop.permute.xlu1 %294   ;;  %457 = vst.msk [vmem:[%s822_s1 + $0x27] ss:$56 sm:$0x3] %vm7_vm0, %v287_v31  }
  0xca   :  { %458 = vst.msk [vmem:[%s822_s1 + $0x60] ss:$-56 sm:$0x3] %vm7_vm0, %v295_v32  }
  0xcc   :  { %v303_v33 = vpop.permute.xlu0 %302  }
  0xcd   :  { %v311_v34 = vpop.permute.xlu1 %310   ;;  %459 = vst.msk [vmem:[%s822_s1 + $0x61] ss:$-56 sm:$0x3] %vm7_vm0, %v303_v33  }
  0xce   :  { %460 = vst.msk [vmem:[%s822_s1 + $0x62] ss:$-56 sm:$0x3] %vm7_vm0, %v311_v34  }
  0xd0   :  { %v319_v35 = vpop.permute.xlu0 %318  }
  0xd1   :  { %v327_v36 = vpop.permute.xlu1 %326   ;;  %461 = vst.msk [vmem:[%s822_s1 + $0x63] ss:$-56 sm:$0x3] %vm7_vm0, %v319_v35  }
  0xd2   :  { %462 = vst.msk [vmem:[%s822_s1 + $0x64] ss:$-56 sm:$0x3] %vm7_vm0, %v327_v36  }
  0xd4   :  { %v335_v37 = vpop.permute.xlu0 %334  }
  0xd5   :  { %v343_v38 = vpop.permute.xlu1 %342   ;;  %463 = vst.msk [vmem:[%s822_s1 + $0x65] ss:$-56 sm:$0x3] %vm7_vm0, %v335_v37  }
  0xd6   :  { %464 = vst.msk [vmem:[%s822_s1 + $0x66] ss:$-56 sm:$0x3] %vm7_vm0, %v343_v38  }
  0xd8   :  { %v351_v39 = vpop.permute.xlu0 %350  }
  0xd9   :  { %v359_v40 = vpop.permute.xlu1 %358   ;;  %465 = vst.msk [vmem:[%s822_s1 + $0x67] ss:$-56 sm:$0x3] %vm7_vm0, %v351_v39  }
  0xda   :  { %466 = vst.msk [vmem:[%s822_s1 + $0x68] ss:$-56 sm:$0x3] %vm7_vm0, %v359_v40  }
  0xdc   :  { %v367_v41 = vpop.permute.xlu0 %366  }
  0xdd   :  { %v375_v42 = vpop.permute.xlu1 %374   ;;  %467 = vst.msk [vmem:[%s822_s1 + $0x69] ss:$-56 sm:$0x3] %vm7_vm0, %v367_v41  }
  0xde   :  { %468 = vst.msk [vmem:[%s822_s1 + $0x6a] ss:$-56 sm:$0x3] %vm7_vm0, %v375_v42  }
  0xe0   :  { %v383_v43 = vpop.permute.xlu0 %382  }
  0xe1   :  { %v391_v44 = vpop.permute.xlu1 %390   ;;  %469 = vst.msk [vmem:[%s822_s1 + $0x6b] ss:$-56 sm:$0x3] %vm7_vm0, %v383_v43  }
  0xe2   :  { %470 = vst.msk [vmem:[%s822_s1 + $0x6c] ss:$-56 sm:$0x3] %vm7_vm0, %v391_v44  }
  0xe4   :  { %v399_v45 = vpop.permute.xlu0 %398  }
  0xe5   :  { %v407_v46 = vpop.permute.xlu1 %406   ;;  %471 = vst.msk [vmem:[%s822_s1 + $0x6d] ss:$-56 sm:$0x3] %vm7_vm0, %v399_v45  }
  0xe6   :  { %472 = vst.msk [vmem:[%s822_s1 + $0x6e] ss:$-56 sm:$0x3] %vm7_vm0, %v407_v46  }
  0xe8   :  { %v415_v47 = vpop.permute.xlu0 %414  }
  0xe9   :  { %473 = vst.msk [vmem:[%s822_s1 + $0x6f] ss:$-56 sm:$0x3] %vm7_vm0, %v415_v47  }

// kernel: discriminator_forward.1
= control target key start
LH: loop header
LB: loop body
LE: loop exit
PB: predicated region body
PF: predicated region fallthrough
CT: control target
= control target key end

     0   :  { %s2151_s29 = smov 0   ;;  %s2431_s0 = inlined_call_operand.vmem [shape: bf16[2,112,128], index: 0, kind: input, shape index: {}]   ;;  %s2432_s1 = inlined_call_operand.vmem [shape: bf16[128,512], index: 1, kind: input, shape index: {}]   ;;  %s2433_s2 = inlined_call_operand.vmem [shape: bf16[2,512,128], index: 2, kind: input, shape index: {}]   ;;  %s2434_s3 = inlined_call_operand.vmem [shape: f32[1,128], index: 3, kind: input, shape index: {}]   ;;  %s2435_s4 = inlined_call_operand.vmem [shape: f32[1,128], index: 4, kind: input, shape index: {}]   ;;  %s2436_s5 = inlined_call_operand.vmem [shape: f32[56,128], index: 5, kind: input, shape index: {}]   ;;  %s2437_s6 = inlined_call_operand.<no memory space> [shape: f32[1,1], index: 6, kind: input, shape index: {}]   ;;  %s2438_s7 = inlined_call_operand.vmem [shape: f32[112,1], index: 7, kind: input, shape index: {}]   ;;  %s2439_s8 = inlined_call_operand.vmem [shape: f32[2,1], index: 8, kind: output, shape index: {}]  }
   0x1   :  { %v13_v0 = vstv %s2437_s6 }
   0x2   :  { %14 = vst [vmem:[#allocation3] sm:$0x1] %v13_v0 }
   0x3 LB: > { %s2157_s30 = sadd.s32 4294967295, %s2098_s29   ;;  %p1785_p0 = scmp.ge.s32.totalorder %s2098_s29, 1  ;;  %s2098_s29 = sphi %s2151_s29, %s20_s29  }
   0x4   : > { %p269_p1 = scmp.lt.s32.totalorder %s2098_s29, 3 }
   0x6   : > { %p270_p2 = pnand %p1785_p0, %p269_p1 }
   0x7   : > { %p303_p3 = scmp.lt.s32.totalorder (!%p270_p2), %s2157_s30, 1  ;;  %p1789_p4 = scmp.ne.s32.totalorder (!%p270_p2), %s2157_s30, 0 }
   0x8   : > { %273 = sbr.rel (%p270_p2) target bundleno = 925 (0x39d), region = 52 }
   0xf   : > { %s304_s6 = scalar_select %p303_p3, %s2157_s30, 1 }
  0x10   : > { %317 = sbr.rel (%p1789_p4) target bundleno = 24 (0x18), region = 56  ;;  %v2100_v1 = vmov (!%p1789_p4), 0.0  }
  0x11   : > { %s1985_s9 = smul.u32 56, %s304_s6  ;;  %s1868_s10 = sshll.u32 %s304_s6, 8  ;;  %318 = vst [vmem:[#allocation2] sm:$0xff] (!%p1789_p4), %v2100_v1  ;;  %319 = vst [vmem:[#allocation2 + $0x8] sm:$0xff] (!%p1789_p4), %v2100_v1 }
  0x12   : > { %s2166_s13 = scalar_lea.vmem %s2433_s2, %s1868_s10  ;;  %320 = vst [vmem:[#allocation2 + $0x10] sm:$0xff] (!%p1789_p4), %v2100_v1  ;;  %321 = vst [vmem:[#allocation2 + $0x18] sm:$0xff] (!%p1789_p4), %v2100_v1 }
  0x13   : > { %s2171_s16 = scalar_lea.vmem %s2431_s0, %s1985_s9  ;;  %322 = vst [vmem:[#allocation2 + $0x20] sm:$0xff] (!%p1789_p4), %v2100_v1  ;;  %323 = vst [vmem:[#allocation2 + $0x28] sm:$0xff] (!%p1789_p4), %v2100_v1 }
  0x14   : > { %324 = vst [vmem:[#allocation2 + $0x30] sm:$0xff] (!%p1789_p4), %v2100_v1  ;;  %325 = vst [vmem:[#allocation2 + $0x38] sm:$0xff] (!%p1789_p4), %v2100_v1 }
  0x15   : > { %326 = vst [vmem:[#allocation2 + $0x40] sm:$0xff] (!%p1789_p4), %v2100_v1  ;;  %327 = vst [vmem:[#allocation2 + $0x48] sm:$0xff] (!%p1789_p4), %v2100_v1 }
  0x16   : > { %328 = vst [vmem:[#allocation2 + $0x50] sm:$0xff] (!%p1789_p4), %v2100_v1  ;;  %329 = vst [vmem:[#allocation2 + $0x58] sm:$0xff] (!%p1789_p4), %v2100_v1 }
  0x17   : > { %330 = vst [vmem:[#allocation2 + $0x60] sm:$0xff] %v2100_v1  ;;  %331 = vst [vmem:[#allocation2 + $0x68] sm:$0xff] %v2100_v1 }
  0x18 PF: > { %v1997_v2 = vld [vmem:[%s2432_s1 + $0x4] ss:$16 sps:$4 sm:$0xff]   ;;  %v1999_v3 = vld [vmem:[%s2432_s1 + $0xc] ss:$16 sps:$4 sm:$0xff]   ;;  %v2101_v4 = vmov 0   ;;  %p1861_p5 = scmp.ne.s32.totalorder %s2157_s30, 1 }
  0x19   : > { %612 = vmatprep.mubr.bf16.mxu0 %v2101_v4  ;;  %715 = vmatprep.mubr.bf16.mxu1 %v2101_v4  ;;  %v2001_v5 = vld [vmem:[%s2432_s1] ss:$16 sps:$4 sm:$0xff]   ;;  %v2002_v6 = vld [vmem:[%s2432_s1 + $0x8] ss:$16 sps:$4 sm:$0xff]   ;;  %v2003_v7 = vld [vmem:[%s2432_s1 + $0x24] ss:$16 sps:$4 sm:$0xff]  }
  0x1a   : > { %580 = vmatprep.subr.bf16.mxu0 %v1997_v2  ;;  %683 = vmatprep.subr.bf16.mxu1 %v1999_v3  ;;  %v2005_v8 = vld [vmem:[%s2432_s1 + $0x2c] ss:$16 sps:$4 sm:$0xff]   ;;  %v2007_v9 = vld [vmem:[%s2432_s1 + $0x20] ss:$16 sps:$4 sm:$0xff]   ;;  %v2008_v10 = vld [vmem:[%s2432_s1 + $0x28] ss:$16 sps:$4 sm:$0xff]  }
  0x1b   : > { %581 = vmatpush1.bf16.msra.mxu0 %v2001_v5  ;;  %684 = vmatpush1.bf16.msra.mxu1 %v2002_v6  ;;  %v2009_v11 = vld [vmem:[%s2432_s1 + $0x44] ss:$16 sps:$4 sm:$0xff]   ;;  %v2011_v12 = vld [vmem:[%s2432_s1 + $0x4c] ss:$16 sps:$4 sm:$0xff]   ;;  %v2013_v13 = vld [vmem:[%s2432_s1 + $0x40] ss:$16 sps:$4 sm:$0xff]  }
  0x1c   : > { %582 = vmatprep.subr.bf16.mxu0 %v2003_v7  ;;  %685 = vmatprep.subr.bf16.mxu1 %v2005_v8  ;;  %v2014_v14 = vld [vmem:[%s2432_s1 + $0x48] ss:$16 sps:$4 sm:$0xff]   ;;  %v2015_v15 = vld [vmem:[%s2432_s1 + $0x64] ss:$16 sps:$4 sm:$0xff]   ;;  %v2017_v16 = vld [vmem:[%s2432_s1 + $0x6c] ss:$16 sps:$4 sm:$0xff]  }
  0x1d   : > { %v2019_v17 = vld [vmem:[%s2432_s1 + $0x60] ss:$16 sps:$4 sm:$0xff]   ;;  %v2020_v18 = vld [vmem:[%s2432_s1 + $0x68] ss:$16 sps:$4 sm:$0xff]   ;;  %v2021_v19 = vld [vmem:[%s2432_s1 + $0x84] ss:$16 sps:$4 sm:$0xff]  }
  0x1e   : > { %v2023_v20 = vld [vmem:[%s2432_s1 + $0x8c] ss:$16 sps:$4 sm:$0xff]   ;;  %v2025_v21 = vld [vmem:[%s2432_s1 + $0x80] ss:$16 sps:$4 sm:$0xff]   ;;  %v2026_v22 = vld [vmem:[%s2432_s1 + $0x88] ss:$16 sps:$4 sm:$0xff]  }
  0x1f   : > { %583 = vmatpush1.bf16.msra.mxu0 %v2007_v9  ;;  %686 = vmatpush1.bf16.msra.mxu1 %v2008_v10  ;;  %v2027_v23 = vld [vmem:[%s2432_s1 + $0xa4] ss:$16 sps:$4 sm:$0xff]   ;;  %v2029_v24 = vld [vmem:[%s2432_s1 + $0xac] ss:$16 sps:$4 sm:$0xff]   ;;  %v2031_v25 = vld [vmem:[%s2432_s1 + $0xa0] ss:$16 sps:$4 sm:$0xff]  }
  0x20   : > { %584 = vmatprep.subr.bf16.mxu0 %v2009_v11  ;;  %687 = vmatprep.subr.bf16.mxu1 %v2011_v12  ;;  %v2032_v26 = vld [vmem:[%s2432_s1 + $0xa8] ss:$16 sps:$4 sm:$0xff]   ;;  %v2033_v27 = vld [vmem:[%s2432_s1 + $0xc4] ss:$16 sps:$4 sm:$0xff]   ;;  %v2035_v28 = vld [vmem:[%s2432_s1 + $0xcc] ss:$16 sps:$4 sm:$0xff]  }
  0x21   : > { %v2037_v29 = vld [vmem:[%s2432_s1 + $0xc0] ss:$16 sps:$4 sm:$0xff]   ;;  %v2038_v30 = vld [vmem:[%s2432_s1 + $0xc8] ss:$16 sps:$4 sm:$0xff]   ;;  %v2039_v31 = vld [vmem:[%s2432_s1 + $0xe4] ss:$16 sps:$4 sm:$0xff]  }
  0x22   : > { %v2041_v32 = vld [vmem:[%s2432_s1 + $0xec] ss:$16 sps:$4 sm:$0xff]   ;;  %v2043_v33 = vld [vmem:[%s2432_s1 + $0xe0] ss:$16 sps:$4 sm:$0xff]   ;;  %v2044_v34 = vld [vmem:[%s2432_s1 + $0xe8] ss:$16 sps:$4 sm:$0xff]  }
  0x23   : > { %585 = vmatpush1.bf16.msra.mxu0 %v2013_v13  ;;  %688 = vmatpush1.bf16.msra.mxu1 %v2014_v14  ;;  %v2045_v35 = vld [vmem:[%s2171_s16] sm:$0xff]   ;;  %v2056_v40 = vld [vmem:[%s2166_s13 + $0x48] sm:$0xff]   ;;  %v2060_v45 = vld [vmem:[%s2166_s13 + $0x50] sm:$0xff]   ;;  %vm1719_vm0 = vcmask (!%p1861_p5), 1041409   ;;  %vm1722_vm1 = vcmask (!%p1861_p5), 1041408   ;;  %vm1740_vm2 = vcmask (!%p1861_p5), 1024  }
  0x24   : > { %586 = vmatprep.subr.bf16.mxu0 %v2015_v15  ;;  %689 = vmatprep.subr.bf16.mxu1 %v2017_v16  ;;  %v2052_v36 = vld [vmem:[%s2166_s13 + $0x40] sm:$0xff]   ;;  %v2057_v41 = vld [vmem:[%s2166_s13 + $0xc8] sm:$0xff]   ;;  %v2061_v46 = vld [vmem:[%s2166_s13 + $0xd0] sm:$0xff]  }
  0x25   : > { %v2053_v37 = vld [vmem:[%s2166_s13 + $0xc0] sm:$0xff]   ;;  %v2058_v42 = vld [vmem:[%s2166_s13 + $0x8] sm:$0xff]   ;;  %v2062_v47 = vld [vmem:[%s2166_s13 + $0x10] sm:$0xff]  }
  0x26   : > { %v2054_v38 = vld [vmem:[%s2166_s13] sm:$0xff]   ;;  %v2059_v43 = vld [vmem:[%s2166_s13 + $0x88] sm:$0xff]   ;;  %v2063_v48 = vld [vmem:[%s2166_s13 + $0x90] sm:$0xff]  }
  0x27   : > { %587 = vmatpush1.bf16.msra.mxu0 %v2019_v17  ;;  %690 = vmatpush1.bf16.msra.mxu1 %v2020_v18  ;;  %v2055_v39 = vld [vmem:[%s2166_s13 + $0x80] sm:$0xff]   ;;  %v2046_v44 = vld [vmem:[%s2171_s16 + $0x8] sm:$0xff]   ;;  %v2064_v49 = vld [vmem:[%s2166_s13 + $0x58] sm:$0xff]  }
  0x28   : > { %588 = vmatprep.subr.bf16.mxu0 %v2021_v19  ;;  %691 = vmatprep.subr.bf16.mxu1 %v2023_v20  ;;  %v2065_v50 = vld [vmem:[%s2166_s13 + $0xd8] sm:$0xff]   ;;  %v2047_v53 = vld [vmem:[%s2171_s16 + $0x10] sm:$0xff]   ;;  %v2068_v54 = vld [vmem:[%s2166_s13 + $0x60] sm:$0xff]  }
  0x29   : > { %v2066_v51 = vld [vmem:[%s2166_s13 + $0x18] sm:$0xff]   ;;  %v2069_v55 = vld [vmem:[%s2166_s13 + $0xe0] sm:$0xff]   ;;  %v2072_v58 = vld [vmem:[%s2166_s13 + $0x68] sm:$0xff]  }
  0x2a   : > { %v2067_v52 = vld [vmem:[%s2166_s13 + $0x98] sm:$0xff]   ;;  %v2070_v56 = vld [vmem:[%s2166_s13 + $0x20] sm:$0xff]   ;;  %v2073_v59 = vld [vmem:[%s2166_s13 + $0xe8] sm:$0xff]  }
  0x2b   : > { %589 = vmatpush1.bf16.msra.mxu0 %v2025_v21  ;;  %692 = vmatpush1.bf16.msra.mxu1 %v2026_v22  ;;  %v2071_v57 = vld [vmem:[%s2166_s13 + $0xa0] sm:$0xff]   ;;  %v2074_v60 = vld [vmem:[%s2166_s13 + $0x28] sm:$0xff]   ;;  %v2048_v62 = vld [vmem:[%s2171_s16 + $0x18] sm:$0xff]  }
  0x2c   : > { %590 = vmatprep.subr.bf16.mxu0 %v2027_v23  ;;  %693 = vmatprep.subr.bf16.mxu1 %v2029_v24  ;;  %v2075_v61 = vld [vmem:[%s2166_s13 + $0xa8] sm:$0xff]   ;;  %v2076_v63 = vld [vmem:[%s2166_s13 + $0x70] sm:$0xff]   ;;  %v2049_v3 = vld [vmem:[%s2171_s16 + $0x20] sm:$0xff]  }
  0x2d   : > { %v2077_v0 = vld [vmem:[%s2166_s13 + $0xf0] sm:$0xff]   ;;  %v2050_v5 = vld [vmem:[%s2171_s16 + $0x28] sm:$0xff]   ;;  %v2080_v7 = vld [vmem:[%s2166_s13 + $0x78] sm:$0xff]  }
  0x2e   : > { %v2078_v1 = vld [vmem:[%s2166_s13 + $0x30] sm:$0xff]   ;;  %v2081_v8 = vld [vmem:[%s2166_s13 + $0xf8] sm:$0xff]  }
  0x2f   : > { %591 = vmatpush1.bf16.msra.mxu0 %v2031_v25  ;;  %694 = vmatpush1.bf16.msra.mxu1 %v2032_v26  ;;  %v2079_v2 = vld [vmem:[%s2166_s13 + $0xb0] sm:$0xff]   ;;  %v2082_v9 = vld [vmem:[%s2166_s13 + $0x38] sm:$0xff]  }
  0x30   : > { %592 = vmatprep.subr.bf16.mxu0 %v2033_v27  ;;  %695 = vmatprep.subr.bf16.mxu1 %v2035_v28  ;;  %v2051_v6 = vld [vmem:[%s2171_s16 + $0x30] sm:$0xff]   ;;  %v2083_v10 = vld [vmem:[%s2166_s13 + $0xb8] sm:$0xff]  }
  0x33   : > { %593 = vmatpush1.bf16.msra.mxu0 %v2037_v29  ;;  %696 = vmatpush1.bf16.msra.mxu1 %v2038_v30 }
  0x34   : > { %594 = vmatprep.subr.bf16.mxu0 %v2039_v31  ;;  %697 = vmatprep.subr.bf16.mxu1 %v2041_v32 }
  0x37   : > { %595 = vmatpush1.bf16.msra.mxu0 %v2043_v33  ;;  %698 = vmatpush1.bf16.msra.mxu1 %v2044_v34 }
  0x38   : > { %1869 = vmatprep.subr.bf16.mxu0 %v2052_v36  ;;  %1927 = vmatprep.subr.bf16.mxu1 %v2053_v37 }
  0x3a   : > { %613 = vmatmul.mubr.bf16.vlgmr.msra.gmra.mrb[0].mxu0 %v2045_v35  ;;  %716 = vmatmul.mubr.bf16.vlgmr.msra.gmra.mrb[0].mxu1 %v2045_v35 }
  0x3b   : > { %622 = vmatprep.mubr.bf16.mxu0 %v2101_v4  ;;  %725 = vmatprep.mubr.bf16.mxu1 %v2101_v4 }
  0x3c   : > { %1870 = vmatpush3.bf16.msra.mxu0 %v2054_v38  ;;  %1928 = vmatpush3.bf16.msra.mxu1 %v2055_v39 }
  0x3d   : > { %1871 = vmatprep.subr.bf16.mxu0 %v2056_v40  ;;  %1929 = vmatprep.subr.bf16.mxu1 %v2057_v41 }
  0x40   : > { %1872 = vmatpush3.bf16.msra.mxu0 %v2058_v42  ;;  %1930 = vmatpush3.bf16.msra.mxu1 %v2059_v43 }
  0x41   : > { %1873 = vmatprep.subr.bf16.mxu0 %v2060_v45  ;;  %1931 = vmatprep.subr.bf16.mxu1 %v2061_v46 }
  0x42   : > { %623 = vmatmul.mubr.bf16.gmra.mrb[4].mxu0 %v2046_v44  ;;  %726 = vmatmul.mubr.bf16.gmra.mrb[4].mxu1 %v2046_v44 }
  0x43   : > { %632 = vmatprep.mubr.bf16.mxu0 %v2101_v4  ;;  %735 = vmatprep.mubr.bf16.mxu1 %v2101_v4 }
  0x44   : > { %1874 = vmatpush3.bf16.msra.mxu0 %v2062_v47  ;;  %1932 = vmatpush3.bf16.msra.mxu1 %v2063_v48 }
  0x45   : > { %1875 = vmatprep.subr.bf16.mxu0 %v2064_v49  ;;  %1933 = vmatprep.subr.bf16.mxu1 %v2065_v50 }
  0x48   : > { %1876 = vmatpush3.bf16.msra.mxu0 %v2066_v51  ;;  %1934 = vmatpush3.bf16.msra.mxu1 %v2067_v52 }
  0x49   : > { %1877 = vmatprep.subr.bf16.mxu0 %v2068_v54  ;;  %1935 = vmatprep.subr.bf16.mxu1 %v2069_v55 }
  0x4a   : > { %633 = vmatmul.mubr.bf16.gmra.mrb[8].mxu0 %v2047_v53  ;;  %736 = vmatmul.mubr.bf16.gmra.mrb[8].mxu1 %v2047_v53 }
  0x4b   : > { %642 = vmatprep.mubr.bf16.mxu0 %v2101_v4  ;;  %745 = vmatprep.mubr.bf16.mxu1 %v2101_v4 }
  0x4c   : > { %1878 = vmatpush3.bf16.msra.mxu0 %v2070_v56  ;;  %1936 = vmatpush3.bf16.msra.mxu1 %v2071_v57 }
  0x4d   : > { %1879 = vmatprep.subr.bf16.mxu0 %v2072_v58  ;;  %1937 = vmatprep.subr.bf16.mxu1 %v2073_v59 }
  0x50   : > { %1880 = vmatpush3.bf16.msra.mxu0 %v2074_v60  ;;  %1938 = vmatpush3.bf16.msra.mxu1 %v2075_v61 }
  0x51   : > { %1881 = vmatprep.subr.bf16.mxu0 %v2076_v63  ;;  %1939 = vmatprep.subr.bf16.mxu1 %v2077_v0 }
  0x52   : > { %643 = vmatmul.mubr.bf16.gmra.mrb[12].mxu0 %v2048_v62  ;;  %746 = vmatmul.mubr.bf16.gmra.mrb[12].mxu1 %v2048_v62 }
  0x53   : > { %652 = vmatprep.mubr.bf16.mxu0 %v2101_v4  ;;  %755 = vmatprep.mubr.bf16.mxu1 %v2101_v4 }
  0x54   : > { %1882 = vmatpush3.bf16.msra.mxu0 %v2078_v1  ;;  %1940 = vmatpush3.bf16.msra.mxu1 %v2079_v2 }
  0x55   : > { %1883 = vmatprep.subr.bf16.mxu0 %v2080_v7  ;;  %1941 = vmatprep.subr.bf16.mxu1 %v2081_v8 }
  0x58   : > { %1884 = vmatpush3.bf16.msra.mxu0 %v2082_v9  ;;  %1942 = vmatpush3.bf16.msra.mxu1 %v2083_v10 }
  0x5a   : > { %653 = vmatmul.mubr.bf16.gmra.mrb[16].mxu0 %v2049_v3  ;;  %756 = vmatmul.mubr.bf16.gmra.mrb[16].mxu1 %v2049_v3 }
  0x5b   : > { %662 = vmatprep.mubr.bf16.mxu0 %v2101_v4  ;;  %765 = vmatprep.mubr.bf16.mxu1 %v2101_v4 }
  0x62   : > { %663 = vmatmul.mubr.bf16.gmra.mrb[20].mxu0 %v2050_v5  ;;  %766 = vmatmul.mubr.bf16.gmra.mrb[20].mxu1 %v2050_v5 }
  0x63   : > { %672 = vmatprep.mubr.bf16.mxu0 %v2101_v4  ;;  %775 = vmatprep.mubr.bf16.mxu1 %v2101_v4 }
  0x6a   : > { %673 = vmatmul.mubr.bf16.gmra.mrb[24].mxu0 %v2051_v6  ;;  %776 = vmatmul.mubr.bf16.gmra.mrb[24].mxu1 %v2051_v6 }
 0x10d   : > { %v614_v11 = vpop.f32.mrb[0].mxu0  ;;  %v717_v12 = vpop.f32.mrb[0].mxu1 }
 0x10e   : > { %v786_v13 = vmul.f32 0.2, %v614_v11  ;;  %v788_v14 = vmul.f32 0.2, %v717_v12  ;;  %v616_v15 = vpop.f32.mrb[1].mxu0  ;;  %v719_v16 = vpop.f32.mrb[1].mxu1 }
 0x10f   : > { %v787_v17 = vmul.f32 0.2, %v616_v15  ;;  %v789_v18 = vmul.f32 0.2, %v719_v16  ;;  %v618_v4 = vpop.f32.mrb[2].mxu0  ;;  %v721_v19 = vpop.f32.mrb[2].mxu1 }
 0x110   : > { %v790_v20 = vmul.f32 0.2, %v618_v4  ;;  %v792_v21 = vmul.f32 0.2, %v721_v19  ;;  %v620_v22 = vpop.f32.mrb[3].mxu0  ;;  %v723_v23 = vpop.f32.mrb[3].mxu1  ;;  %v842_v26 = vmax.f32 %v614_v11, %v786_v13  ;;  %v844_v27 = vmax.f32 %v717_v12, %v788_v14 }
 0x111   : > { %v791_v24 = vmul.f32 0.2, %v620_v22  ;;  %v793_v25 = vmul.f32 0.2, %v723_v23  ;;  %v843_v30 = vmax.f32 %v616_v15, %v787_v17  ;;  %v845_v31 = vmax.f32 %v719_v16, %v789_v18 }
 0x112   : > { %v846_v28 = vmax.f32 %v618_v4, %v790_v20  ;;  %v848_v29 = vmax.f32 %v721_v19, %v792_v21 }
 0x113   : > { %v847_v32 = vmax.f32 %v620_v22, %v791_v24  ;;  %v849_v33 = vmax.f32 %v723_v23, %v793_v25 }
 0x114   : > { %v898_v34 = vpack.c.bf16 %v846_v28, %v842_v26  ;;  %v900_v35 = vpack.c.bf16 %v848_v29, %v844_v27 }
 0x115   : > { %v899_v36 = vpack.c.bf16 %v847_v32, %v843_v30  ;;  %v901_v37 = vpack.c.bf16 %v849_v33, %v845_v31  ;;  %v624_v38 = vpop.f32.mrb[4].mxu0  ;;  %v727_v39 = vpop.f32.mrb[4].mxu1 }
 0x116   : > { %v794_v40 = vmul.f32 0.2, %v624_v38  ;;  %v796_v41 = vmul.f32 0.2, %v727_v39  ;;  %v626_v42 = vpop.f32.mrb[5].mxu0  ;;  %v729_v43 = vpop.f32.mrb[5].mxu1 }
 0x117   : > { %v795_v44 = vmul.f32 0.2, %v626_v42  ;;  %v797_v45 = vmul.f32 0.2, %v729_v43  ;;  %v628_v46 = vpop.f32.mrb[6].mxu0  ;;  %v731_v47 = vpop.f32.mrb[6].mxu1  ;;  %1228 = vmatprep.mubr.bf16.mxu0 %v899_v36  ;;  %1317 = vmatprep.mubr.bf16.mxu1 %v901_v37 }
 0x118   : > { %v798_v48 = vmul.f32 0.2, %v628_v46  ;;  %v800_v49 = vmul.f32 0.2, %v731_v47  ;;  %v630_v50 = vpop.f32.mrb[7].mxu0  ;;  %v733_v51 = vpop.f32.mrb[7].mxu1  ;;  %1229 = vmatmul.mubr.bf16.vlgmr.msra.gmra.mrb[28].mxu0 %v898_v34  ;;  %1318 = vmatmul.mubr.bf16.vlgmr.msra.gmra.mrb[28].mxu1 %v900_v35  ;;  %v850_v54 = vmax.f32 %v624_v38, %v794_v40  ;;  %v852_v55 = vmax.f32 %v727_v39, %v796_v41 }
 0x119   : > { %v799_v52 = vmul.f32 0.2, %v630_v50  ;;  %v801_v53 = vmul.f32 0.2, %v733_v51  ;;  %v851_v58 = vmax.f32 %v626_v42, %v795_v44  ;;  %v853_v59 = vmax.f32 %v729_v43, %v797_v45 }
 0x11a   : > { %v854_v56 = vmax.f32 %v628_v46, %v798_v48  ;;  %v856_v57 = vmax.f32 %v731_v47, %v800_v49 }
 0x11b   : > { %v855_v60 = vmax.f32 %v630_v50, %v799_v52  ;;  %v857_v61 = vmax.f32 %v733_v51, %v801_v53 }
 0x11c   : > { %v902_v62 = vpack.c.bf16 %v854_v56, %v850_v54  ;;  %v904_v63 = vpack.c.bf16 %v856_v57, %v852_v55 }
 0x11d   : > { %v903_v0 = vpack.c.bf16 %v855_v60, %v851_v58  ;;  %v905_v1 = vpack.c.bf16 %v857_v61, %v853_v59  ;;  %v634_v2 = vpop.f32.mrb[8].mxu0  ;;  %v737_v3 = vpop.f32.mrb[8].mxu1 }
 0x11e   : > { %v802_v5 = vmul.f32 0.2, %v634_v2  ;;  %v804_v6 = vmul.f32 0.2, %v737_v3  ;;  %v636_v7 = vpop.f32.mrb[9].mxu0  ;;  %v739_v8 = vpop.f32.mrb[9].mxu1 }
 0x11f   : > { %v803_v9 = vmul.f32 0.2, %v636_v7  ;;  %v805_v10 = vmul.f32 0.2, %v739_v8  ;;  %v638_v11 = vpop.f32.mrb[10].mxu0  ;;  %v741_v12 = vpop.f32.mrb[10].mxu1  ;;  %1236 = vmatprep.mubr.bf16.mxu0 %v903_v0  ;;  %1325 = vmatprep.mubr.bf16.mxu1 %v905_v1 }
 0x120   : > { %v806_v13 = vmul.f32 0.2, %v638_v11  ;;  %v808_v14 = vmul.f32 0.2, %v741_v12  ;;  %v640_v15 = vpop.f32.mrb[11].mxu0  ;;  %v743_v16 = vpop.f32.mrb[11].mxu1  ;;  %1237 = vmatmul.mubr.bf16.gmra.mrb[32].mxu0 %v902_v62  ;;  %1326 = vmatmul.mubr.bf16.gmra.mrb[32].mxu1 %v904_v63  ;;  %v858_v4 = vmax.f32 %v634_v2, %v802_v5  ;;  %v860_v19 = vmax.f32 %v737_v3, %v804_v6 }
 0x121   : > { %v807_v17 = vmul.f32 0.2, %v640_v15  ;;  %v809_v18 = vmul.f32 0.2, %v743_v16  ;;  %v859_v22 = vmax.f32 %v636_v7, %v803_v9  ;;  %v861_v23 = vmax.f32 %v739_v8, %v805_v10 }
 0x122   : > { %v862_v20 = vmax.f32 %v638_v11, %v806_v13  ;;  %v864_v21 = vmax.f32 %v741_v12, %v808_v14 }
 0x123   : > { %v863_v24 = vmax.f32 %v640_v15, %v807_v17  ;;  %v865_v25 = vmax.f32 %v743_v16, %v809_v18 }
 0x124   : > { %v906_v26 = vpack.c.bf16 %v862_v20, %v858_v4  ;;  %v908_v27 = vpack.c.bf16 %v864_v21, %v860_v19 }
 0x125   : > { %v907_v28 = vpack.c.bf16 %v863_v24, %v859_v22  ;;  %v909_v29 = vpack.c.bf16 %v865_v25, %v861_v23  ;;  %v644_v30 = vpop.f32.mrb[12].mxu0  ;;  %v747_v31 = vpop.f32.mrb[12].mxu1 }
 0x126   : > { %v810_v32 = vmul.f32 0.2, %v644_v30  ;;  %v812_v33 = vmul.f32 0.2, %v747_v31  ;;  %v646_v34 = vpop.f32.mrb[13].mxu0  ;;  %v749_v35 = vpop.f32.mrb[13].mxu1 }
 0x127   : > { %v811_v36 = vmul.f32 0.2, %v646_v34  ;;  %v813_v37 = vmul.f32 0.2, %v749_v35  ;;  %v648_v38 = vpop.f32.mrb[14].mxu0  ;;  %v751_v39 = vpop.f32.mrb[14].mxu1  ;;  %1244 = vmatprep.mubr.bf16.mxu0 %v907_v28  ;;  %1333 = vmatprep.mubr.bf16.mxu1 %v909_v29 }
 0x128   : > { %v814_v40 = vmul.f32 0.2, %v648_v38  ;;  %v816_v41 = vmul.f32 0.2, %v751_v39  ;;  %v650_v42 = vpop.f32.mrb[15].mxu0  ;;  %v753_v43 = vpop.f32.mrb[15].mxu1  ;;  %1245 = vmatmul.mubr.bf16.gmra.mrb[36].mxu0 %v906_v26  ;;  %1334 = vmatmul.mubr.bf16.gmra.mrb[36].mxu1 %v908_v27  ;;  %v866_v46 = vmax.f32 %v644_v30, %v810_v32  ;;  %v868_v47 = vmax.f32 %v747_v31, %v812_v33 }
 0x129   : > { %v815_v44 = vmul.f32 0.2, %v650_v42  ;;  %v817_v45 = vmul.f32 0.2, %v753_v43  ;;  %v867_v50 = vmax.f32 %v646_v34, %v811_v36  ;;  %v869_v51 = vmax.f32 %v749_v35, %v813_v37 }
 0x12a   : > { %v870_v48 = vmax.f32 %v648_v38, %v814_v40  ;;  %v872_v49 = vmax.f32 %v751_v39, %v816_v41 }
 0x12b   : > { %v871_v52 = vmax.f32 %v650_v42, %v815_v44  ;;  %v873_v53 = vmax.f32 %v753_v43, %v817_v45 }
 0x12c   : > { %v910_v54 = vpack.c.bf16 %v870_v48, %v866_v46  ;;  %v912_v55 = vpack.c.bf16 %v872_v49, %v868_v47 }
 0x12d   : > { %v911_v56 = vpack.c.bf16 %v871_v52, %v867_v50  ;;  %v913_v57 = vpack.c.bf16 %v873_v53, %v869_v51  ;;  %v654_v58 = vpop.f32.mrb[16].mxu0  ;;  %v757_v59 = vpop.f32.mrb[16].mxu1 }
 0x12e   : > { %v818_v60 = vmul.f32 0.2, %v654_v58  ;;  %v820_v61 = vmul.f32 0.2, %v757_v59  ;;  %v656_v62 = vpop.f32.mrb[17].mxu0  ;;  %v759_v63 = vpop.f32.mrb[17].mxu1 }
 0x12f   : > { %v819_v0 = vmul.f32 0.2, %v656_v62  ;;  %v821_v1 = vmul.f32 0.2, %v759_v63  ;;  %v658_v2 = vpop.f32.mrb[18].mxu0  ;;  %v761_v3 = vpop.f32.mrb[18].mxu1  ;;  %1252 = vmatprep.mubr.bf16.mxu0 %v911_v56  ;;  %1341 = vmatprep.mubr.bf16.mxu1 %v913_v57 }
 0x130   : > { %v822_v5 = vmul.f32 0.2, %v658_v2  ;;  %v824_v6 = vmul.f32 0.2, %v761_v3  ;;  %v660_v7 = vpop.f32.mrb[19].mxu0  ;;  %v763_v8 = vpop.f32.mrb[19].mxu1  ;;  %1253 = vmatmul.mubr.bf16.gmra.mrb[40].mxu0 %v910_v54  ;;  %1342 = vmatmul.mubr.bf16.gmra.mrb[40].mxu1 %v912_v55  ;;  %v874_v11 = vmax.f32 %v654_v58, %v818_v60  ;;  %v876_v12 = vmax.f32 %v757_v59, %v820_v61 }
 0x131   : > { %v823_v9 = vmul.f32 0.2, %v660_v7  ;;  %v825_v10 = vmul.f32 0.2, %v763_v8  ;;  %v875_v15 = vmax.f32 %v656_v62, %v819_v0  ;;  %v877_v16 = vmax.f32 %v759_v63, %v821_v1 }
 0x132   : > { %v878_v13 = vmax.f32 %v658_v2, %v822_v5  ;;  %v880_v14 = vmax.f32 %v761_v3, %v824_v6 }
 0x133   : > { %v879_v17 = vmax.f32 %v660_v7, %v823_v9  ;;  %v881_v18 = vmax.f32 %v763_v8, %v825_v10 }
 0x134   : > { %v914_v4 = vpack.c.bf16 %v878_v13, %v874_v11  ;;  %v916_v19 = vpack.c.bf16 %v880_v14, %v876_v12 }
 0x135   : > { %v915_v20 = vpack.c.bf16 %v879_v17, %v875_v15  ;;  %v917_v21 = vpack.c.bf16 %v881_v18, %v877_v16  ;;  %v664_v22 = vpop.f32.mrb[20].mxu0  ;;  %v767_v23 = vpop.f32.mrb[20].mxu1 }
 0x136   : > { %v826_v24 = vmul.f32 0.2, %v664_v22  ;;  %v828_v25 = vmul.f32 0.2, %v767_v23  ;;  %v666_v26 = vpop.f32.mrb[21].mxu0  ;;  %v769_v27 = vpop.f32.mrb[21].mxu1 }
 0x137   : > { %v827_v28 = vmul.f32 0.2, %v666_v26  ;;  %v829_v29 = vmul.f32 0.2, %v769_v27  ;;  %v668_v30 = vpop.f32.mrb[22].mxu0  ;;  %v771_v31 = vpop.f32.mrb[22].mxu1  ;;  %1260 = vmatprep.mubr.bf16.mxu0 %v915_v20  ;;  %1349 = vmatprep.mubr.bf16.mxu1 %v917_v21 }
 0x138   : > { %v830_v32 = vmul.f32 0.2, %v668_v30  ;;  %v832_v33 = vmul.f32 0.2, %v771_v31  ;;  %v670_v34 = vpop.f32.mrb[23].mxu0  ;;  %v773_v35 = vpop.f32.mrb[23].mxu1  ;;  %1261 = vmatmul.mubr.bf16.gmra.mrb[44].mxu0 %v914_v4  ;;  %1350 = vmatmul.mubr.bf16.gmra.mrb[44].mxu1 %v916_v19  ;;  %v882_v38 = vmax.f32 %v664_v22, %v826_v24  ;;  %v884_v39 = vmax.f32 %v767_v23, %v828_v25 }
 0x139   : > { %v831_v36 = vmul.f32 0.2, %v670_v34  ;;  %v833_v37 = vmul.f32 0.2, %v773_v35  ;;  %v883_v42 = vmax.f32 %v666_v26, %v827_v28  ;;  %v885_v43 = vmax.f32 %v769_v27, %v829_v29  ;;  %v926_v22 = vld [vmem:[#allocation2] sm:$0xff]  ;;  %v927_v28 = vld [vmem:[#allocation2 + $0x8] sm:$0xff] }
 0x13a   : > { %v886_v40 = vmax.f32 %v668_v30, %v830_v32  ;;  %v888_v41 = vmax.f32 %v771_v31, %v832_v33 }
 0x13b   : > { %v887_v44 = vmax.f32 %v670_v34, %v831_v36  ;;  %v889_v45 = vmax.f32 %v773_v35, %v833_v37 }
 0x13c   : > { %v918_v46 = vpack.c.bf16 %v886_v40, %v882_v38  ;;  %v920_v47 = vpack.c.bf16 %v888_v41, %v884_v39  ;;  %v928_v40 = vld [vmem:[#allocation2 + $0x10] sm:$0xff] }
 0x13d   : > { %v919_v48 = vpack.c.bf16 %v887_v44, %v883_v42  ;;  %v921_v49 = vpack.c.bf16 %v889_v45, %v885_v43  ;;  %v674_v50 = vpop.f32.mrb[24].mxu0  ;;  %v777_v51 = vpop.f32.mrb[24].mxu1 }
 0x13e   : > { %v834_v52 = vmul.f32 0.2, %v674_v50  ;;  %v836_v53 = vmul.f32 0.2, %v777_v51  ;;  %v676_v54 = vpop.f32.mrb[25].mxu0  ;;  %v779_v55 = vpop.f32.mrb[25].mxu1 }
 0x13f   : > { %v835_v56 = vmul.f32 0.2, %v676_v54  ;;  %v837_v57 = vmul.f32 0.2, %v779_v55  ;;  %v678_v58 = vpop.f32.mrb[26].mxu0  ;;  %v781_v59 = vpop.f32.mrb[26].mxu1  ;;  %1268 = vmatprep.mubr.bf16.mxu0 %v919_v48  ;;  %1357 = vmatprep.mubr.bf16.mxu1 %v921_v49 }
 0x140   : > { %v838_v60 = vmul.f32 0.2, %v678_v58  ;;  %v840_v61 = vmul.f32 0.2, %v781_v59  ;;  %v680_v62 = vpop.f32.mrb[27].mxu0  ;;  %v783_v63 = vpop.f32.mrb[27].mxu1  ;;  %1269 = vmatmul.mubr.bf16.gmra.mrb[48].mxu0 %v918_v46  ;;  %1358 = vmatmul.mubr.bf16.gmra.mrb[48].mxu1 %v920_v47  ;;  %v890_v2 = vmax.f32 %v674_v50, %v834_v52  ;;  %v892_v3 = vmax.f32 %v777_v51, %v836_v53 }
 0x141   : > { %v839_v0 = vmul.f32 0.2, %v680_v62  ;;  %v841_v1 = vmul.f32 0.2, %v783_v63  ;;  %v891_v7 = vmax.f32 %v676_v54, %v835_v56  ;;  %v893_v8 = vmax.f32 %v779_v55, %v837_v57  ;;  %v929_v46 = vld [vmem:[#allocation2 + $0x18] sm:$0xff] }
 0x142   : > { %v894_v5 = vmax.f32 %v678_v58, %v838_v60  ;;  %v896_v6 = vmax.f32 %v781_v59, %v840_v61  ;;  %v930_v58 = vld [vmem:[#allocation2 + $0x20] sm:$0xff] }
 0x143   : > { %v895_v9 = vmax.f32 %v680_v62, %v839_v0  ;;  %v897_v10 = vmax.f32 %v783_v63, %v841_v1  ;;  %v931_v0 = vld [vmem:[#allocation2 + $0x28] sm:$0xff] }
 0x144   : > { %v922_v11 = vpack.c.bf16 %v894_v5, %v890_v2  ;;  %v924_v12 = vpack.c.bf16 %v896_v6, %v892_v3 }
 0x145   : > { %v923_v13 = vpack.c.bf16 %v895_v9, %v891_v7  ;;  %v925_v14 = vpack.c.bf16 %v897_v10, %v893_v8 }
 0x147   : > { %1276 = vmatprep.mubr.bf16.mxu0 %v923_v13  ;;  %1365 = vmatprep.mubr.bf16.mxu1 %v925_v14  ;;  %v932_v13 = vld [vmem:[#allocation2 + $0x30] sm:$0xff] }
 0x148   : > { %1277 = vmatmul.mubr.bf16.gmra.mrb[52].mxu0 %v922_v11  ;;  %1366 = vmatmul.mubr.bf16.gmra.mrb[52].mxu1 %v924_v12 }
 0x1eb   : > { %v1885_v15 = vpop.f32.mrb[28].mxu0  ;;  %v1943_v16 = vpop.f32.mrb[28].mxu1 }
 0x1ec   : > { %v1886_v17 = vpop.f32.mrb[29].mxu0  ;;  %v1944_v18 = vpop.f32.mrb[29].mxu1 }
 0x1ed   : > { %v1887_v4 = vadd.f32 %v1886_v17, %v1885_v15  ;;  %v1945_v19 = vadd.f32 %v1944_v18, %v1943_v16  ;;  %v1888_v20 = vpop.f32.mrb[30].mxu0  ;;  %v1946_v21 = vpop.f32.mrb[30].mxu1 }
 0x1ee   : > { %v1889_v23 = vpop.f32.mrb[31].mxu0  ;;  %v1947_v24 = vpop.f32.mrb[31].mxu1 }
 0x1ef   : > { %v1320_v25 = vadd.f32 %v1945_v19, %v1887_v4  ;;  %v1890_v26 = vadd.f32 %v1889_v23, %v1888_v20  ;;  %v1948_v27 = vadd.f32 %v1947_v24, %v1946_v21  ;;  %v933_v4 = vld [vmem:[#allocation2 + $0x38] sm:$0xff] }
 0x1f1   : > { %v1374_v29 = vadd.f32 %v1320_v25, %v926_v22  ;;  %v1323_v30 = vadd.f32 %v1948_v27, %v1890_v26 }
 0x1f3   : > { %1388 = vst [vmem:[#allocation2] sm:$0xff] %v1374_v29  ;;  %v1375_v31 = vadd.f32 %v1323_v30, %v927_v28  ;;  %v1891_v32 = vpop.f32.mrb[32].mxu0  ;;  %v1949_v33 = vpop.f32.mrb[32].mxu1  ;;  %v934_v30 = vld [vmem:[#allocation2 + $0x40] sm:$0xff] }
 0x1f4   : > { %v1892_v34 = vpop.f32.mrb[33].mxu0  ;;  %v1950_v35 = vpop.f32.mrb[33].mxu1 }
 0x1f5   : > { %1389 = vst [vmem:[#allocation2 + $0x8] sm:$0xff] %v1375_v31  ;;  %v1893_v36 = vadd.f32 %v1892_v34, %v1891_v32  ;;  %v1951_v37 = vadd.f32 %v1950_v35, %v1949_v33  ;;  %v1894_v38 = vpop.f32.mrb[34].mxu0  ;;  %v1952_v39 = vpop.f32.mrb[34].mxu1 }
 0x1f6   : > { %v1895_v41 = vpop.f32.mrb[35].mxu0  ;;  %v1953_v42 = vpop.f32.mrb[35].mxu1 }
 0x1f7   : > { %v1328_v43 = vadd.f32 %v1951_v37, %v1893_v36  ;;  %v1896_v44 = vadd.f32 %v1895_v41, %v1894_v38  ;;  %v1954_v45 = vadd.f32 %v1953_v42, %v1952_v39  ;;  %v935_v36 = vld [vmem:[#allocation2 + $0x48] sm:$0xff] }
 0x1f9   : > { %v1376_v47 = vadd.f32 %v1328_v43, %v928_v40  ;;  %v1331_v48 = vadd.f32 %v1954_v45, %v1896_v44 }
 0x1fb   : > { %1390 = vst [vmem:[#allocation2 + $0x10] sm:$0xff] %v1376_v47  ;;  %v1377_v49 = vadd.f32 %v1331_v48, %v929_v46  ;;  %v1897_v50 = vpop.f32.mrb[36].mxu0  ;;  %v1955_v51 = vpop.f32.mrb[36].mxu1  ;;  %v936_v48 = vld [vmem:[#allocation2 + $0x50] sm:$0xff] }
 0x1fc   : > { %v1898_v52 = vpop.f32.mrb[37].mxu0  ;;  %v1956_v53 = vpop.f32.mrb[37].mxu1 }
 0x1fd   : > { %1391 = vst [vmem:[#allocation2 + $0x18] sm:$0xff] %v1377_v49  ;;  %v1899_v54 = vadd.f32 %v1898_v52, %v1897_v50  ;;  %v1957_v55 = vadd.f32 %v1956_v53, %v1955_v51  ;;  %v1900_v56 = vpop.f32.mrb[38].mxu0  ;;  %v1958_v57 = vpop.f32.mrb[38].mxu1 }
 0x1fe   : > { %v1901_v59 = vpop.f32.mrb[39].mxu0  ;;  %v1959_v60 = vpop.f32.mrb[39].mxu1 }
 0x1ff   : > { %v1336_v61 = vadd.f32 %v1957_v55, %v1899_v54  ;;  %v1902_v62 = vadd.f32 %v1901_v59, %v1900_v56  ;;  %v1960_v63 = vadd.f32 %v1959_v60, %v1958_v57  ;;  %v937_v54 = vld [vmem:[#allocation2 + $0x58] sm:$0xff] }
 0x201   : > { %v1378_v1 = vadd.f32 %v1336_v61, %v930_v58  ;;  %v1339_v2 = vadd.f32 %v1960_v63, %v1902_v62 }
 0x203   : > { %1392 = vst [vmem:[#allocation2 + $0x20] sm:$0xff] %v1378_v1  ;;  %v1379_v3 = vadd.f32 %v1339_v2, %v931_v0  ;;  %v1903_v5 = vpop.f32.mrb[40].mxu0  ;;  %v1961_v6 = vpop.f32.mrb[40].mxu1  ;;  %v938_v2 = vld [vmem:[#allocation2 + $0x60] sm:$0xff] }
 0x204   : > { %v1904_v7 = vpop.f32.mrb[41].mxu0  ;;  %v1962_v8 = vpop.f32.mrb[41].mxu1 }
 0x205   : > { %1393 = vst [vmem:[#allocation2 + $0x28] sm:$0xff] %v1379_v3  ;;  %v1905_v9 = vadd.f32 %v1904_v7, %v1903_v5  ;;  %v1963_v10 = vadd.f32 %v1962_v8, %v1961_v6  ;;  %v1906_v11 = vpop.f32.mrb[42].mxu0  ;;  %v1964_v12 = vpop.f32.mrb[42].mxu1 }
 0x206   : > { %v1907_v14 = vpop.f32.mrb[43].mxu0  ;;  %v1965_v15 = vpop.f32.mrb[43].mxu1 }
 0x207   : > { %v1344_v16 = vadd.f32 %v1963_v10, %v1905_v9  ;;  %v1908_v17 = vadd.f32 %v1907_v14, %v1906_v11  ;;  %v1966_v18 = vadd.f32 %v1965_v15, %v1964_v12  ;;  %v939_v9 = vld [vmem:[#allocation2 + $0x68] sm:$0xff]  ;;  %v1420_v14 = vld [vmem:[%s2438_s7] sm:$0xff] (!%p1861_p5)  ;;  %v2102_v15 = vmov (!%p1861_p5), 0  }
 0x208   : > { %2085 = vset.pattern.permute.xlu1 (!%p1861_p5), %v2102_v15  ;;  %2084 = vset.pattern.permute.xlu0 (!%p1861_p5), %v2102_v15 }
 0x209   : > { %v1380_v19 = vadd.f32 %v1344_v16, %v932_v13  ;;  %v1347_v20 = vadd.f32 %v1966_v18, %v1908_v17  ;;  %v1422_v13 = vld [vmem:[%s2438_s7 + $0x10] sm:$0xff] (!%p1861_p5)  ;;  %1470 = vperm.xlu0 (!%p1861_p5), %2084, %v1420_v14   ;;  %v1423_v16 = vld [vmem:[%s2438_s7 + $0x18] sm:$0xff] (!%p1861_p5)  ;;  %v1421_v17 = vld [vmem:[%s2438_s7 + $0x8] sm:$0xff] (!%p1861_p5) }
 0x20a   : > { %1480 = vperm.xlu1 (!%p1861_p5), %2085, %v1422_v13   ;;  %v1425_v18 = vld [vmem:[%s2438_s7 + $0x28] sm:$0xff] (!%p1861_p5) }
 0x20b   : > { %1394 = vst [vmem:[#allocation2 + $0x30] sm:$0xff] %v1380_v19  ;;  %v1381_v21 = vadd.f32 %v1347_v20, %v933_v4  ;;  %v1909_v22 = vpop.f32.mrb[44].mxu0  ;;  %v1967_v23 = vpop.f32.mrb[44].mxu1  ;;  %v1424_v4 = vld [vmem:[%s2438_s7 + $0x20] sm:$0xff] (!%p1861_p5)  ;;  %v1427_v19 = vld [vmem:[%s2438_s7 + $0x38] sm:$0xff] (!%p1861_p5)  ;;  %v1426_v20 = vld [vmem:[%s2438_s7 + $0x30] sm:$0xff] (!%p1861_p5) }
 0x20c   : > { %v1910_v24 = vpop.f32.mrb[45].mxu0  ;;  %v1968_v25 = vpop.f32.mrb[45].mxu1 }
 0x20d   : > { %1395 = vst [vmem:[#allocation2 + $0x38] sm:$0xff] %v1381_v21  ;;  %v1911_v26 = vadd.f32 %v1910_v24, %v1909_v22  ;;  %v1969_v27 = vadd.f32 %v1968_v25, %v1967_v23  ;;  %v1912_v28 = vpop.f32.mrb[46].mxu0  ;;  %v1970_v29 = vpop.f32.mrb[46].mxu1  ;;  %1475 = vperm.xlu0 (!%p1861_p5), %2084, %v1421_v17   ;;  %v1429_v21 = vld [vmem:[%s2438_s7 + $0x48] sm:$0xff] (!%p1861_p5)  ;;  %v1428_v22 = vld [vmem:[%s2438_s7 + $0x40] sm:$0xff] (!%p1861_p5)  ;;  %v1431_v23 = vld [vmem:[%s2438_s7 + $0x58] sm:$0xff] (!%p1861_p5) }
 0x20e   : > { %v1913_v31 = vpop.f32.mrb[47].mxu0  ;;  %v1971_v32 = vpop.f32.mrb[47].mxu1  ;;  %1485 = vperm.xlu1 (!%p1861_p5), %2085, %v1423_v16   ;;  %v1430_v24 = vld [vmem:[%s2438_s7 + $0x50] sm:$0xff] (!%p1861_p5)  ;;  %v1433_v25 = vld [vmem:[%s2438_s7 + $0x68] sm:$0xff] (!%p1861_p5) }
 0x20f   : > { %v1352_v33 = vadd.f32 %v1969_v27, %v1911_v26  ;;  %v1914_v34 = vadd.f32 %v1913_v31, %v1912_v28  ;;  %v1972_v35 = vadd.f32 %v1971_v32, %v1970_v29  ;;  %v1432_v26 = vld [vmem:[%s2438_s7 + $0x60] sm:$0xff] (!%p1861_p5)  ;;  %v1407_v28 = vld [vmem:[#allocation2 + $0x8] sm:$0xff] (!%p1861_p5)  ;;  %v1409_v32 = vld [vmem:[#allocation2 + $0x18] sm:$0xff] (!%p1861_p5) }
 0x210   : > { %v1406_v27 = vld [vmem:[#allocation2] sm:$0xff] (!%p1861_p5) }
 0x211   : > { %v1382_v37 = vadd.f32 %v1352_v33, %v934_v30  ;;  %v1355_v38 = vadd.f32 %v1972_v35, %v1914_v34  ;;  %1490 = vperm.xlu0 (!%p1861_p5), %2084, %v1424_v4   ;;  %v1434_v29 = vadd.f32 (!%p1861_p5), %v1407_v28, %v1406_v27  ;;  %v1408_v30 = vld [vmem:[#allocation2 + $0x10] sm:$0xff] (!%p1861_p5)  ;;  %v1410_v34 = vld [vmem:[#allocation2 + $0x20] sm:$0xff] (!%p1861_p5) }
 0x212   : > { %1495 = vperm.xlu1 (!%p1861_p5), %2085, %v1425_v18  }
 0x213   : > { %1396 = vst [vmem:[#allocation2 + $0x40] sm:$0xff] %v1382_v37  ;;  %v1383_v39 = vadd.f32 %v1355_v38, %v935_v36  ;;  %v1915_v40 = vpop.f32.mrb[48].mxu0  ;;  %v1973_v41 = vpop.f32.mrb[48].mxu1  ;;  %v1435_v31 = vadd.f32 (!%p1861_p5), %v1434_v29, %v1408_v30  ;;  %v1411_v36 = vld [vmem:[#allocation2 + $0x28] sm:$0xff] (!%p1861_p5)  ;;  %v1412_v38 = vld [vmem:[#allocation2 + $0x30] sm:$0xff] (!%p1861_p5) }
 0x214   : > { %v1916_v42 = vpop.f32.mrb[49].mxu0  ;;  %v1974_v43 = vpop.f32.mrb[49].mxu1 }
 0x215   : > { %1397 = vst [vmem:[#allocation2 + $0x48] sm:$0xff] %v1383_v39  ;;  %v1917_v44 = vadd.f32 %v1916_v42, %v1915_v40  ;;  %v1975_v45 = vadd.f32 %v1974_v43, %v1973_v41  ;;  %v1918_v46 = vpop.f32.mrb[50].mxu0  ;;  %v1976_v47 = vpop.f32.mrb[50].mxu1  ;;  %1500 = vperm.xlu0 (!%p1861_p5), %2084, %v1426_v20   ;;  %v1436_v33 = vadd.f32 (!%p1861_p5), %v1435_v31, %v1409_v32  ;;  %v1413_v40 = vld [vmem:[#allocation2 + $0x38] sm:$0xff] (!%p1861_p5) }
 0x216   : > { %v1919_v49 = vpop.f32.mrb[51].mxu0  ;;  %v1977_v50 = vpop.f32.mrb[51].mxu1  ;;  %1505 = vperm.xlu1 (!%p1861_p5), %2085, %v1427_v19  }
 0x217   : > { %v1360_v51 = vadd.f32 %v1975_v45, %v1917_v44  ;;  %v1920_v52 = vadd.f32 %v1919_v49, %v1918_v46  ;;  %v1978_v53 = vadd.f32 %v1977_v50, %v1976_v47  ;;  %v1437_v35 = vadd.f32 (!%p1861_p5), %v1436_v33, %v1410_v34 }
 0x219   : > { %v1384_v55 = vadd.f32 %v1360_v51, %v936_v48  ;;  %v1363_v56 = vadd.f32 %v1978_v53, %v1920_v52  ;;  %1510 = vperm.xlu0 (!%p1861_p5), %2084, %v1428_v22   ;;  %v1438_v37 = vadd.f32 (!%p1861_p5), %v1437_v35, %v1411_v36 }
 0x21a   : > { %1515 = vperm.xlu1 (!%p1861_p5), %2085, %v1429_v21   ;;  %v1414_v42 = vld [vmem:[#allocation2 + $0x40] sm:$0xff] (!%p1861_p5) }
 0x21b   : > { %1398 = vst [vmem:[#allocation2 + $0x50] sm:$0xff] %v1384_v55  ;;  %v1385_v57 = vadd.f32 %v1363_v56, %v937_v54  ;;  %v1921_v58 = vpop.f32.mrb[52].mxu0  ;;  %v1979_v59 = vpop.f32.mrb[52].mxu1  ;;  %v1439_v39 = vadd.f32 (!%p1861_p5), %v1438_v37, %v1412_v38 }
 0x21c   : > { %v1922_v60 = vpop.f32.mrb[53].mxu0  ;;  %v1980_v61 = vpop.f32.mrb[53].mxu1  ;;  %v1415_v44 = vld [vmem:[#allocation2 + $0x48] sm:$0xff] (!%p1861_p5) }
 0x21d   : > { %1399 = vst [vmem:[#allocation2 + $0x58] sm:$0xff] %v1385_v57  ;;  %v1923_v62 = vadd.f32 %v1922_v60, %v1921_v58  ;;  %v1981_v63 = vadd.f32 %v1980_v61, %v1979_v59  ;;  %v1924_v0 = vpop.f32.mrb[54].mxu0  ;;  %v1982_v1 = vpop.f32.mrb[54].mxu1  ;;  %1520 = vperm.xlu0 (!%p1861_p5), %2084, %v1430_v24   ;;  %v1440_v41 = vadd.f32 (!%p1861_p5), %v1439_v39, %v1413_v40 }
 0x21e   : > { %v1925_v3 = vpop.f32.mrb[55].mxu0  ;;  %v1983_v5 = vpop.f32.mrb[55].mxu1  ;;  %1525 = vperm.xlu1 (!%p1861_p5), %2085, %v1431_v23  }
 0x21f   : > { %v1368_v6 = vadd.f32 %v1981_v63, %v1923_v62  ;;  %v1926_v7 = vadd.f32 %v1925_v3, %v1924_v0  ;;  %v1984_v8 = vadd.f32 %v1983_v5, %v1982_v1  ;;  %1405 = sbr.rel (%p1861_p5) target bundleno = 925 (0x39d), region = 60  ;;  %v1441_v43 = vadd.f32 (!%p1861_p5), %v1440_v41, %v1414_v42 }
 0x221   : > { %v1386_v10 = vadd.f32 %v1368_v6, %v938_v2  ;;  %v1371_v11 = vadd.f32 %v1984_v8, %v1926_v7  ;;  %1530 = vperm.xlu0 (!%p1861_p5), %2084, %v1432_v26   ;;  %v1442_v45 = vadd.f32 (!%p1861_p5), %v1441_v43, %v1415_v44 }
 0x222   : > { %1535 = vperm.xlu1 (!%p1861_p5), %2085, %v1433_v25   ;;  %v1416_v46 = vld [vmem:[#allocation2 + $0x50] sm:$0xff] (!%p1861_p5) }
 0x223   : > { %1400 = vst [vmem:[#allocation2 + $0x60] sm:$0xff] %v1386_v10  ;;  %v1387_v12 = vadd.f32 %v1371_v11, %v939_v9  ;;  %v1443_v47 = vadd.f32 (!%p1861_p5), %v1442_v45, %v1416_v46 }
 0x224   : > { %v1417_v48 = vld [vmem:[#allocation2 + $0x58] sm:$0xff] (!%p1861_p5) }
 0x225   : > { %1401 = vst [vmem:[#allocation2 + $0x68] sm:$0xff] %v1387_v12  ;;  %v1444_v49 = vadd.f32 (!%p1861_p5), %v1443_v47, %v1417_v48 }
 0x22a   : > { %v1418_v50 = vld [vmem:[#allocation2 + $0x60] sm:$0xff] }
 0x22b   : > { %v1445_v51 = vadd.f32 %v1444_v49, %v1418_v50 }
 0x22c   : > { %v2366_v52 = vld [vmem:[#allocation2 + $0x68] sm:$0xff] }
 0x22d   : > { %v1446_v53 = vadd.f32 %v1445_v51, %v2366_v52 }
 0x22f   : > { %v1447_v54 = vrot.slane %v1446_v53, 4 }
 0x231   : > { %v1448_v55 = vadd.f32 %v1447_v54, %v1446_v53 }
 0x233   : > { %v1449_v56 = vrot.slane %v1448_v55, 2 }
 0x235   : > { %v1450_v57 = vadd.f32 %v1449_v56, %v1448_v55 }
 0x237   : > { %v1451_v58 = vrot.slane %v1450_v57, 1 }
 0x239   : > { %v1452_v59 = vadd.f32 %v1451_v58, %v1450_v57 }
 0x23b   : > { %v1453_v60 = vmul.f32 0.010204081, %v1452_v59 }
 0x23d   : > { %v2369_v61 = vsub.f32 %v1406_v27, %v1453_v60  ;;  %v2371_v0 = vsub.f32 %v1408_v30, %v1453_v60  ;;  %v2373_v1 = vsub.f32 %v1407_v28, %v1453_v60  ;;  %v2376_v3 = vsub.f32 %v1409_v32, %v1453_v60 }
 0x23e   : > { %v2380_v9 = vsub.f32 %v1410_v34, %v1453_v60  ;;  %v2383_v13 = vsub.f32 %v1411_v36, %v1453_v60  ;;  %v2386_v4 = vsub.f32 %v1412_v38, %v1453_v60  ;;  %v1461_v22 = vsub.f32 %v1413_v40, %v1453_v60 }
 0x23f   : > { %v1462_v28 = vsub.f32 %v1414_v42, %v1453_v60  ;;  %v1463_v32 = vsub.f32 %v1415_v44, %v1453_v60  ;;  %v1464_v38 = vsub.f32 %v1416_v46, %v1453_v60  ;;  %v1465_v43 = vsub.f32 %v1417_v48, %v1453_v60 }
 0x240   : > { %v1466_v42 = vsub.f32 %v1418_v50, %v1453_v60  ;;  %v1467_v44 = vsub.f32 %v2366_v52, %v1453_v60 }
 0x288   : > { %v1471_v63 = vpop.permute.xlu0 %1470 }
 0x289   : > { %v1481_v62 = vpop.permute.xlu1 %1480  ;;  %v1538_v2 = vmul.f32 %v1471_v63, %v2369_v61 }
 0x28a   : > { %v1540_v7 = vmul.f32 %v1481_v62, %v2371_v0 }
 0x28b   : > { %v1552_v10 = vmul.f32 %v1538_v2, %v1538_v2 }
 0x28c   : > { %v1476_v6 = vpop.permute.xlu0 %1475  ;;  %v1554_v16 = vmul.f32 %v1540_v7, %v1540_v7 }
 0x28d   : > { %v1486_v5 = vpop.permute.xlu1 %1485  ;;  %v1539_v8 = vmul.f32 %v1476_v6, %v2373_v1 }
 0x28e   : > { %v1541_v11 = vmul.f32 %v1486_v5, %v2376_v3 }
 0x28f   : > { %v1553_v12 = vmul.f32 %v1539_v8, %v1539_v8 }
 0x290   : > { %v1491_v15 = vpop.permute.xlu0 %1490  ;;  %v1555_v19 = vmul.f32 %v1541_v11, %v1541_v11 }
 0x291   : > { %v1496_v14 = vpop.permute.xlu1 %1495  ;;  %v1566_v17 = vadd.f32 %v1553_v12, %v1552_v10  ;;  %v1542_v18 = vmul.f32 %v1491_v15, %v2380_v9 }
 0x292   : > { %v1543_v21 = vmul.f32 %v1496_v14, %v2383_v13 }
 0x293   : > { %v1567_v20 = vadd.f32 %v1566_v17, %v1554_v16  ;;  %v1556_v25 = vmul.f32 %v1542_v18, %v1542_v18 }
 0x294   : > { %v1501_v24 = vpop.permute.xlu0 %1500  ;;  %v1557_v29 = vmul.f32 %v1543_v21, %v1543_v21 }
 0x295   : > { %v1506_v23 = vpop.permute.xlu1 %1505  ;;  %v1568_v26 = vadd.f32 %v1567_v20, %v1555_v19  ;;  %v1544_v27 = vmul.f32 %v1501_v24, %v2386_v4  ;;  %v1862_v20 = vld [vmem:[%s2434_s3] ss:$0 sm:$0xff] }
 0x296   : > { %v1545_v31 = vmul.f32 %v1506_v23, %v1461_v22 }
 0x297   : > { %v1569_v30 = vadd.f32 %v1568_v26, %v1556_v25  ;;  %v1558_v35 = vmul.f32 %v1544_v27, %v1544_v27 }
 0x298   : > { %v1511_v34 = vpop.permute.xlu0 %1510  ;;  %v1559_v39 = vmul.f32 %v1545_v31, %v1545_v31 }
 0x299   : > { %v1516_v33 = vpop.permute.xlu1 %1515  ;;  %v1570_v36 = vadd.f32 %v1569_v30, %v1557_v29  ;;  %v1546_v37 = vmul.f32 %v1511_v34, %v1462_v28 }
 0x29a   : > { %v1547_v40 = vmul.f32 %v1516_v33, %v1463_v32 }
 0x29b   : > { %v1571_v41 = vadd.f32 %v1570_v36, %v1558_v35  ;;  %v1560_v49 = vmul.f32 %v1546_v37, %v1546_v37 }
 0x29c   : > { %v1521_v47 = vpop.permute.xlu0 %1520  ;;  %v1561_v54 = vmul.f32 %v1547_v40, %v1547_v40 }
 0x29d   : > { %v1526_v45 = vpop.permute.xlu1 %1525  ;;  %v1572_v51 = vadd.f32 %v1571_v41, %v1559_v39  ;;  %v1548_v53 = vmul.f32 %v1521_v47, %v1464_v38 }
 0x29e   : > { %v1549_v56 = vmul.f32 %v1526_v45, %v1465_v43 }
 0x29f   : > { %v1573_v55 = vadd.f32 %v1572_v51, %v1560_v49  ;;  %v1562_v59 = vmul.f32 %v1548_v53, %v1548_v53 }
 0x2a0   : > { %v1531_v58 = vpop.permute.xlu0 %1530  ;;  %v1563_v63 = vmul.f32 %v1549_v56, %v1549_v56 }
 0x2a1   : > { %v1536_v57 = vpop.permute.xlu1 %1535  ;;  %v1574_v62 = vadd.f32 %v1573_v55, %v1561_v54  ;;  %v1550_v46 = vmul.f32 %v1531_v58, %v1466_v42 }
 0x2a2   : > { %v1551_v5 = vmul.f32 %v1536_v57, %v1467_v44 }
 0x2a3   : > { %v1575_v2 = vadd.f32 %v1574_v62, %v1562_v59  ;;  %v1564_v48 = vmul.f32 %v1550_v46, %v1550_v46 }
 0x2a4   : > { %v1565_v7 = vmul.f32 %v1551_v5, %v1551_v5 }
 0x2a5   : > { %v1576_v6 = vadd.f32 %v1575_v2, %v1563_v63 }
 0x2a7   : > { %v1577_v8 = vadd.f32 %v1576_v6, %v1564_v48  ;;  %v1672_v48 = vld [vmem:[%s2436_s5] sm:$0xff]  ;;  %v1673_v6 = vld [vmem:[%s2436_s5 + $0x8] sm:$0xff] }
 0x2a9   : > { %v1578_v10 = vadd.f32 %v1577_v8, %v1565_v7 }
 0x2ab   : > { %v1579_v11 = vrot.slane %v1578_v10, 4 }
 0x2ad   : > { %v1580_v50 = vadd.f32 %v1579_v11, %v1578_v10 }
 0x2af   : > { %v1581_v12 = vrot.slane %v1580_v50, 2 }
 0x2b1   : > { %v1582_v14 = vadd.f32 %v1581_v12, %v1580_v50 }
 0x2b3   : > { %v1583_v15 = vrot.slane %v1582_v14, 1 }
 0x2b5   : > { %v1584_v16 = vadd.f32 %v1583_v15, %v1582_v14 }
 0x2b7   : > { %v1585_v52 = vmul.f32 0.010204081, %v1584_v16 }
 0x2b9   : > { %v1586_v60 = vadd.f32 1e-05, %v1585_v52 }
 0x2bb   : > { %2086 = vrsqrt.f32 %v1586_v60  ;;  %v1674_v60 = vld [vmem:[%s2436_s5 + $0x10] sm:$0xff] }
 0x2c5   : > { %v2087_v17 = vpop.eup %2086 }
 0x2c6   : > { %v1588_v18 = vmul.f32 %v2087_v17, %v2369_v61  ;;  %v1589_v19 = vmul.f32 %v2087_v17, %v2373_v1  ;;  %v1590_v21 = vmul.f32 %v2087_v17, %v2371_v0  ;;  %v1595_v23 = vmul.f32 %v2087_v17, %v1461_v22  ;;  %v1863_v61 = vld [vmem:[%s2435_s4] ss:$0 sm:$0xff] }
 0x2c7   : > { %v1596_v24 = vmul.f32 %v2087_v17, %v1462_v28  ;;  %v1591_v25 = vmul.f32 %v2087_v17, %v2376_v3  ;;  %v1597_v26 = vmul.f32 %v2087_v17, %v1463_v32  ;;  %v1598_v27 = vmul.f32 %v2087_v17, %v1464_v38 }
 0x2c8   : > { %v1609_v29 = vmul.f32 %v1862_v20, %v1588_v18  ;;  %v1610_v30 = vmul.f32 %v1862_v20, %v1589_v19  ;;  %v1592_v1 = vmul.f32 %v2087_v17, %v2380_v9  ;;  %v1599_v31 = vmul.f32 %v2087_v17, %v1465_v43 }
 0x2c9   : > { %v1611_v33 = vmul.f32 %v1862_v20, %v1590_v21  ;;  %v1593_v34 = vmul.f32 %v2087_v17, %v2383_v13  ;;  %v1616_v35 = vmul.f32 %v1862_v20, %v1595_v23  ;;  %v1617_v0 = vmul.f32 %v1862_v20, %v1596_v24  ;;  %v1675_v24 = vld [vmem:[%s2436_s5 + $0x18] sm:$0xff] }
 0x2ca   : > { %v1600_v22 = vmul.f32 %v2087_v17, %v1466_v42  ;;  %v1594_v28 = vmul.f32 %v2087_v17, %v2386_v4  ;;  %v1612_v3 = vmul.f32 %v1862_v20, %v1591_v25  ;;  %v1618_v32 = vmul.f32 %v1862_v20, %v1597_v26 }
 0x2cb   : > { %v1601_v36 = vmul.f32 %v2087_v17, %v1467_v44  ;;  %v1619_v37 = vmul.f32 %v1862_v20, %v1598_v27  ;;  %v1630_v38 = vadd.f32 %v1863_v61, %v1609_v29  ;;  %v1631_v39 = vadd.f32 %v1863_v61, %v1610_v30 }
 0x2cc   : > { %v1613_v41 = vmul.f32 %v1862_v20, %v1592_v1  ;;  %v1620_v40 = vmul.f32 %v1862_v20, %v1599_v31  ;;  %v1632_v45 = vadd.f32 %v1863_v61, %v1611_v33  ;;  %v1614_v47 = vmul.f32 %v1862_v20, %v1593_v34  ;;  %v1676_v33 = vld [vmem:[%s2436_s5 + $0x20] sm:$0xff] }
 0x2cd   : > { %v1637_v9 = vadd.f32 %v1863_v61, %v1616_v35  ;;  %v1638_v43 = vadd.f32 %v1863_v61, %v1617_v0  ;;  %v1621_v49 = vmul.f32 %v1862_v20, %v1600_v22  ;;  %v1615_v51 = vmul.f32 %v1862_v20, %v1594_v28 }
 0x2ce   : > { %v1633_v13 = vadd.f32 %v1863_v61, %v1612_v3  ;;  %v1639_v53 = vadd.f32 %v1863_v61, %v1618_v32  ;;  %v1622_v54 = vmul.f32 %v1862_v20, %v1601_v36  ;;  %v1640_v42 = vadd.f32 %v1863_v61, %v1619_v37  ;;  %v1677_v3 = vld [vmem:[%s2436_s5 + $0x28] sm:$0xff] }
 0x2cf   : > { %v1644_v55 = vmul.f32 0.2, %v1630_v38  ;;  %v1645_v4 = vmul.f32 0.2, %v1631_v39  ;;  %v1634_v56 = vadd.f32 %v1863_v61, %v1613_v41  ;;  %v1641_v57 = vadd.f32 %v1863_v61, %v1620_v40 }
 0x2d0   : > { %v1646_v44 = vmul.f32 0.2, %v1632_v45  ;;  %v1651_v58 = vmul.f32 0.2, %v1637_v9  ;;  %v1652_v59 = vmul.f32 0.2, %v1638_v43  ;;  %v1635_v63 = vadd.f32 %v1863_v61, %v1614_v47 }
 0x2d1   : > { %v1653_v62 = vmul.f32 0.2, %v1639_v53  ;;  %v1658_v46 = vmax.f32 %v1630_v38, %v1644_v55  ;;  %v1647_v2 = vmul.f32 0.2, %v1633_v13  ;;  %v1659_v5 = vmax.f32 %v1631_v39, %v1645_v4 }
 0x2d2   : > { %v1642_v7 = vadd.f32 %v1863_v61, %v1621_v49  ;;  %v1636_v8 = vadd.f32 %v1863_v61, %v1615_v51  ;;  %v1643_v10 = vadd.f32 %v1863_v61, %v1622_v54  ;;  %v1654_v11 = vmul.f32 0.2, %v1640_v42 }
 0x2d3   : > { %v1648_v50 = vmul.f32 0.2, %v1634_v56  ;;  %v1660_v12 = vmax.f32 %v1632_v45, %v1646_v44  ;;  %v1665_v14 = vmax.f32 %v1637_v9, %v1651_v58  ;;  %v1666_v15 = vmax.f32 %v1638_v43, %v1652_v59  ;;  %v1678_v45 = vld [vmem:[%s2436_s5 + $0x30] sm:$0xff] }
 0x2d4   : > { %v1655_v16 = vmul.f32 0.2, %v1641_v57  ;;  %v1667_v52 = vmax.f32 %v1639_v53, %v1653_v62  ;;  %v1679_v17 = vmul.f32 %v1672_v48, %v1658_v46  ;;  %v1680_v18 = vmul.f32 %v1673_v6, %v1659_v5 }
 0x2d5   : > { %v1649_v19 = vmul.f32 0.2, %v1635_v63  ;;  %v1661_v20 = vmax.f32 %v1633_v13, %v1647_v2  ;;  %v1656_v21 = vmul.f32 0.2, %v1642_v7  ;;  %v1668_v23 = vmax.f32 %v1640_v42, %v1654_v11  ;;  %v1864_v11 = vld [vmem:[#allocation3] ss:$0 sm:$0xff] }
 0x2d6   : > { %v1686_v25 = vmul.f32 %v1672_v48, %v1665_v14  ;;  %v1687_v26 = vmul.f32 %v1673_v6, %v1666_v15  ;;  %v1650_v27 = vmul.f32 0.2, %v1636_v8  ;;  %v1662_v29 = vmax.f32 %v1634_v56, %v1648_v50 }
 0x2d7   : > { %v1681_v30 = vmul.f32 %v1674_v60, %v1660_v12  ;;  %v1693_v61 = vadd.f32 %v1680_v18, %v1679_v17  ;;  %v1657_v1 = vmul.f32 0.2, %v1643_v10  ;;  %v1669_v31 = vmax.f32 %v1641_v57, %v1655_v16 }
 0x2d8   : > { %v1688_v34 = vmul.f32 %v1674_v60, %v1667_v52  ;;  %v1705_v35 = vadd.f32 %v1687_v26, %v1686_v25  ;;  %v1663_v0 = vmax.f32 %v1635_v63, %v1649_v19  ;;  %v1682_v22 = vmul.f32 %v1675_v24, %v1661_v20 }
 0x2d9   : > { %v1694_v28 = vadd.f32 %v1693_v61, %v1681_v30  ;;  %v1670_v32 = vmax.f32 %v1642_v7, %v1656_v21  ;;  %v1689_v36 = vmul.f32 %v1675_v24, %v1668_v23  ;;  %v1664_v38 = vmax.f32 %v1636_v8, %v1650_v27 }
 0x2da   : > { %v1706_v37 = vadd.f32 %v1705_v35, %v1688_v34  ;;  %v1683_v39 = vmul.f32 %v1676_v33, %v1662_v29  ;;  %v1671_v40 = vmax.f32 %v1643_v10, %v1657_v1  ;;  %v1690_v47 = vmul.f32 %v1676_v33, %v1669_v31 }
 0x2db   : > { %v1695_v41 = vadd.f32 %v1694_v28, %v1682_v22  ;;  %v1684_v43 = vmul.f32 %v1677_v3, %v1663_v0  ;;  %v1691_v51 = vmul.f32 %v1677_v3, %v1670_v32  ;;  %v1685_v53 = vmul.f32 %v1678_v45, %v1664_v38 }
 0x2dc   : > { %v1707_v9 = vadd.f32 %v1706_v37, %v1689_v36  ;;  %v1692_v42 = vmul.f32 %v1678_v45, %v1671_v40 }
 0x2dd   : > { %v1696_v49 = vadd.f32 %v1695_v41, %v1683_v39 }
 0x2de   : > { %v1708_v13 = vadd.f32 %v1707_v9, %v1690_v47 }
 0x2df   : > { %v1697_v54 = vadd.f32 %v1696_v49, %v1684_v43 }
 0x2e0   : > { %v1709_v55 = vadd.f32 %v1708_v13, %v1691_v51 }
 0x2e1   : > { %v1698_v4 = vadd.f32 %v1697_v54, %v1685_v53 }
 0x2e2   : > { %v1710_v56 = vadd.f32 %v1709_v55, %v1692_v42 }
 0x2e3   : > { %v1699_v57 = vrot.slane %v1698_v4, 4 }
 0x2e4   : > { %v1711_v44 = vrot.slane %v1710_v56, 4 }
 0x2e5   : > { %v1700_v58 = vadd.f32 %v1699_v57, %v1698_v4 }
 0x2e6   : > { %v1712_v59 = vadd.f32 %v1711_v44, %v1710_v56 }
 0x2e7   : > { %v1701_v62 = vrot.slane %v1700_v58, 2 }
 0x2e8   : > { %v1713_v46 = vrot.slane %v1712_v59, 2 }
 0x2e9   : > { %v1702_v63 = vadd.f32 %v1701_v62, %v1700_v58 }
 0x2ea   : > { %v1714_v2 = vadd.f32 %v1713_v46, %v1712_v59 }
 0x2eb   : > { %v1703_v5 = vrot.slane %v1702_v63, 1 }
 0x2ec   : > { %v1715_v48 = vrot.slane %v1714_v2, 1 }
 0x2ed   : > { %v1704_v6 = vadd.f32 %v1703_v5, %v1702_v63 }
 0x2ee   : > { %v1716_v7 = vadd.f32 %v1715_v48, %v1714_v2 }
 0x2f0   : > { %v1720_v8 = vsel %vm1719_vm0, %v1716_v7, %v1704_v6 }
 0x2f1   : > { %v1723_v10 = vsel %vm1722_vm1, %v1720_v8, 0.0 }
 0x2f2   : > { %1724 = vadd.xlane.f32.xlu0 %v1723_v10 }
 0x37f   : > { %v1725_v50 = vpop.xlane.xlu0 %1724 }
 0x380   : > { %v1733_v12 = vadd.f32 %v1864_v11, %v1725_v50 }
 0x382   : > { %v1865_v14 = vmul.f32 -1.442695, %v1733_v12 }
 0x384   : > { %2088 = vpow2.f32 %v1865_v14 }
 0x38e   : > { %v2089_v15 = vpop.eup %2088 }
 0x38f   : > { %v1737_v16 = vadd.f32 1.0, %v2089_v15 }
 0x391   : > { %2090 = vrcp.f32 %v1737_v16 }
 0x39b   : > { %v2091_v52 = vpop.eup %2090 }
 0x39c   : > { %1741 = vst.msk [vmem:[%s2439_s8] sm:$0x3] %vm1740_vm2, %v2091_v52 }
 0x39d PF: > { %s20_s29 = sadd.s32 1, %s2098_s29  }
 0x39e   : > { %p17_p6 = scmp.ge.s32.totalorder %s20_s29, 4  }
 0x3a0   :  { %19 = sbr.rel (!%p17_p6) target bundleno = 3 (0x3), region = 89 }

</bundles_post_ra>
